<compile_context>
chip_gen: v5e
topology: v5e:2x2
jax: 0.10.0
libtpu: 0.0.40
codegen_flags: <defaults>
</compile_context>

<pallas_src>
import jax
import jax.numpy as jnp
from jax.experimental import pallas as pl
from jax.experimental.pallas import tpu as pltpu


# Static problem sizes (match the example input (2, 3, 16, 16)).
C = 3
H = W = 16             # input spatial
O1 = H + 2             # conv1 output spatial (1x1, pad=1):          18
PW1 = O1 + 2           # conv2 zero-padded input spatial:            20
H2 = PW1 - 4           # conv2 output spatial (3x3, dil=2):          16
PW2 = H2 + 2           # conv3 zero-padded input spatial:            18
H3 = PW2 - 4           # conv3 output spatial (3x3, dil=2):          14
AW2 = 2 * PW1 + H2     # lane-folded conv2 accumulator width:        56
AW3 = 2 * PW2 + H3     # lane-folded conv3 accumulator width:        50
TAB = 2 * 27 + 2       # weight-table rows: 27 w2 taps, b2, 27 w3 taps, b3 = 56
B2_ROW, W3_ROW0, B3_ROW = 27, 28, 55


def _fused_kernel(x_ref, scal_ref, wtab_ref, o_ref, rep1, rep2):
    # x_ref   : VMEM (1, 3, 16, 16)   -- batch element 0 only (selected by BlockSpec)
    # scal_ref: SMEM f32[12]          -- conv1 weights (9, co-major) + conv1 biases (3)
    # wtab_ref: VMEM (56, 56)         -- lane-replicated conv2/conv3 weight & bias rows
    # o_ref   : VMEM (1, 3, 14, 14)
    # rep1    : VMEM (3, 20, 60)  3x lane-tiled zero-padded conv1 output (conv2 input)
    # rep2    : VMEM (3, 18, 54)  3x lane-tiled zero-padded conv2 output (conv3 input)
    xs = [x_ref[0, c] for c in range(C)]

    # Zero fill gives the outermost zero ring of every replica in both rep buffers.
    rep1[...] = jnp.zeros_like(rep1)
    rep2[...] = jnp.zeros_like(rep2)

    # ---- conv1 (1x1, pad=1) fused into rep1 construction -------------------------
    # conv1 output is 18x18: interior = b1 + sum_ci w1*x, border ring = b1 (zero pad
    # through a 1x1 conv). Write the bias square then the body into each lane replica.
    for co in range(C):
        b = scal_ref[9 + co]
        body = jnp.full((H, W), b) \
            + scal_ref[3 * co + 0] * xs[0] \
            + scal_ref[3 * co + 1] * xs[1] \
            + scal_ref[3 * co + 2] * xs[2]
        ring = jnp.full((O1, O1), b)
        for r in range(C):
            base = r * PW1
            rep1[co, 1:1 + O1, base + 1:base + 1 + O1] = ring
            rep1[co, 2:2 + H, base + 2:base + 2 + W] = body

    # ---- conv2 (3x3, dil=2, pad=1), output channels folded along lanes -----------
    # acc2[h, PW1*co + w] == out2[co, h, w]; per-ci partial sums expose ILP.
    # NOTE: lane-offset tap slices land on the idle XLU (shifts), not the binding VALU.
    parts = []
    for ci in range(C):
        part = None
        for i in range(3):
            for j in range(3):
                t = (ci * 3 + i) * 3 + j
                term = wtab_ref[t:t + 1, :] * rep1[ci, 2 * i:2 * i + H2, 2 * j:2 * j + AW2]
                part = term if part is None else part + term
        parts.append(part)
    acc2 = parts[0] + parts[1] + (parts[2] + wtab_ref[B2_ROW:B2_ROW + 1, :])   # (16, 56)

    # Scatter conv2 output channels into the rep2 interiors (zero-padded, 3x tiled).
    for c in range(C):
        y2 = acc2[:, PW1 * c:PW1 * c + H2]            # (16, 16) conv2 output channel c
        for r in range(C):
            base = r * PW2
            rep2[c, 1:1 + H2, base + 1:base + 1 + H2] = y2

    # ---- conv3 (3x3, dil=2, pad=1), output channels folded along lanes -----------
    parts = []
    for ci in range(C):
        part = None
        for i in range(3):
            for j in range(3):
                t = (ci * 3 + i) * 3 + j
                term = wtab_ref[W3_ROW0 + t:W3_ROW0 + t + 1, 0:AW3] * \
                    rep2[ci, 2 * i:2 * i + H3, 2 * j:2 * j + AW3]
                part = term if part is None else part + term
        parts.append(part)
    acc3 = parts[0] + parts[1] + (parts[2] + wtab_ref[B3_ROW:B3_ROW + 1, 0:AW3])  # (14, 50)

    # ---- unfold the lane-packed result back to NCHW and store --------------------
    for co in range(C):
        o_ref[0, co, :, :] = acc3[:, PW2 * co:PW2 * co + H3]


def pack_params(p):
    """One-time packing of the conv params into the kernel's SMEM/VMEM operands."""
    f32 = jnp.float32
    # conv1: 9 scalar weights (co-major) + 3 biases -> flat SMEM f32[12]
    scal = jnp.concatenate([p["w1"].reshape(-1).astype(f32), p["b1"].astype(f32)])

    def tap_rows(w, stride, width):
        # Row t = ci*9 + i*3 + j; lanes [stride*co, stride*(co+1)) carry w[co, ci, i, j].
        rows = []
        for ci in range(C):
            for i in range(3):
                for j in range(3):
                    rows.append(jnp.repeat(w[:, ci, i, j].astype(f32), stride)[:width])
        return jnp.stack(rows)

    w2rows = tap_rows(p["w2"], PW1, AW2)                              # (27, 56)
    b2row = jnp.repeat(p["b2"].astype(f32), PW1)[:AW2][None, :]       # (1, 56)
    w3rows = tap_rows(p["w3"], PW2, AW3)                              # (27, 50)
    b3row = jnp.repeat(p["b3"].astype(f32), PW2)[:AW3][None, :]       # (1, 50)
    low = jnp.pad(jnp.concatenate([w3rows, b3row], axis=0), ((0, 0), (0, AW2 - AW3)))
    wtab = jnp.concatenate([w2rows, b2row, low], axis=0)              # (56, 56)
    return {"scal": scal, "wtab": wtab}


def testblock20_forward(x, packed):
    """Fused forward pass. x: (N, 3, 16, 16) -> (1, 3, 14, 14)."""
    N, Cin, Hin, Win = x.shape
    assert N >= 1 and (Cin, Hin, Win) == (C, H, W), x.shape
    f32 = jnp.float32
    return pl.pallas_call(
        _fused_kernel,
        out_shape=jax.ShapeDtypeStruct((1, C, H3, H3), f32),
        grid=(1,),
        in_specs=[
            # Only batch element 0 is ever used downstream -> fetch just that block.
            pl.BlockSpec((1, C, H, W), lambda n: (0, 0, 0, 0)),
            pl.BlockSpec(memory_space=pltpu.MemorySpace.SMEM),   # packed conv1 scalars
            pl.BlockSpec((TAB, AW2), lambda n: (0, 0)),          # conv2/conv3 weight table
        ],
        out_specs=pl.BlockSpec((1, C, H3, H3), lambda n: (0, 0, 0, 0)),
        scratch_shapes=[
            pltpu.VMEM((C, PW1, C * PW1), f32),   # rep1 (3, 20, 60)
            pltpu.VMEM((C, PW2, C * PW2), f32),   # rep2 (3, 18, 54)
        ],
    )(x.astype(f32), packed["scal"], packed["wtab"])


def init_params(key):
    """Deterministic params mimicking torch.nn.Conv2d default init (U[-1/sqrt(fan_in), +])."""
    def conv_init(k, cout, cin, ksz):
        kw_, kb_ = jax.random.split(k)
        fan_in = cin * ksz * ksz
        bound = 1.0 / jnp.sqrt(fan_in)
        w = jax.random.uniform(kw_, (cout, cin, ksz, ksz), jnp.float32, -bound, bound)
        b = jax.random.uniform(kb_, (cout,), jnp.float32, -bound, bound)
        return w, b

    k1, k2, k3 = jax.random.split(key, 3)
    w1, b1 = conv_init(k1, 3, 3, 1)   # conv1: 1x1, padding=1
    w2, b2 = conv_init(k2, 3, 3, 3)   # conv2: 3x3, dilation=2, padding=1
    w3, b3 = conv_init(k3, 3, 3, 3)   # conv3: 3x3, dilation=2, padding=1
    return dict(w1=w1, b1=b1, w2=w2, b2=b2, w3=w3, b3=b3)


# ---------------- pure-JAX reference (for correctness check only) ----------------
def _conv_ref(x, w, b, *, dilation, padding):
    out = jax.lax.conv_general_dilated(
        x, w, window_strides=(1, 1),
        padding=[(padding, padding), (padding, padding)],
        rhs_dilation=(dilation, dilation),
        dimension_numbers=("NCHW", "OIHW", "NCHW"),
    )
    return out + b[None, :, None, None]


def _forward_ref(x, p):
    x = _conv_ref(x, p["w1"], p["b1"], dilation=1, padding=1)
    x = x[0:1]
    x = _conv_ref(x, p["w2"], p["b2"], dilation=2, padding=1)
    x = _conv_ref(x, p["w3"], p["b3"], dilation=2, padding=1)
    return x


if __name__ == "__main__":
    key = jax.random.PRNGKey(0)
    kx, kp = jax.random.split(key)
    x = jax.random.normal(kx, (2, C, H, W), jnp.float32)
    params = init_params(kp)
    packed = pack_params(params)      # one-time operand packing (not per-call)

    out = jax.block_until_ready(testblock20_forward(x, packed))
    assert out.shape == (1, C, H3, H3), out.shape

    ref = jax.block_until_ready(_forward_ref(x, params))
    assert jnp.allclose(out, ref, rtol=1e-4, atol=1e-4), float(jnp.max(jnp.abs(out - ref)))

    print("KERNEL_OK")
</pallas_src>

<mosaic_0001>
module attributes {stable_mosaic.version = 11 : i64} {
  func.func @_fused_kernel(%arg0: i32, %arg1: memref<1x3x16x16xf32, #tpu.memory_space<vmem>>, %arg2: memref<12xf32, #tpu.memory_space<smem>>, %arg3: memref<56x56xf32, #tpu.memory_space<vmem>>, %arg4: memref<1x3x14x14xf32, #tpu.memory_space<vmem>>, %arg5: memref<3x20x60xf32, #tpu.memory_space<vmem>>, %arg6: memref<3x18x54xf32, #tpu.memory_space<vmem>>) attributes {dimension_semantics = [#tpu.dimension_semantics<arbitrary>], iteration_bounds = array<i64: 1>, scalar_prefetch = 0 : i64, scratch_operands = 2 : i64, tpu.core_type = #tpu.core_type<tc>, window_params = [{transform_indices = @transform_0, window_bounds = array<i64: 1, 3, 16, 16>}, {transform_indices = @transform_1, window_bounds = array<i64: 12>}, {pipeline_mode = #tpu.pipeline_mode<synchronous>, transform_indices = @transform_2, window_bounds = array<i64: 56, 56>}, {pipeline_mode = #tpu.pipeline_mode<synchronous>, transform_indices = @transform_3, window_bounds = array<i64: 1, 3, 14, 14>}]} {
    %c0 = arith.constant 0 : index
    %c0_0 = arith.constant 0 : index
    %c0_1 = arith.constant 0 : index
    %c0_2 = arith.constant 0 : index
    %0 = vector.load %arg1[%c0, %c0_0, %c0_1, %c0_2] : memref<1x3x16x16xf32, #tpu.memory_space<vmem>>, vector<1x1x16x16xf32>
    %1 = vector.shape_cast %0 : vector<1x1x16x16xf32> to vector<16x16xf32>
    %c0_3 = arith.constant 0 : index
    %c1 = arith.constant 1 : index
    %c0_4 = arith.constant 0 : index
    %c0_5 = arith.constant 0 : index
    %2 = vector.load %arg1[%c0_3, %c1, %c0_4, %c0_5] : memref<1x3x16x16xf32, #tpu.memory_space<vmem>>, vector<1x1x16x16xf32>
    %3 = vector.shape_cast %2 : vector<1x1x16x16xf32> to vector<16x16xf32>
    %c0_6 = arith.constant 0 : index
    %c2 = arith.constant 2 : index
    %c0_7 = arith.constant 0 : index
    %c0_8 = arith.constant 0 : index
    %4 = vector.load %arg1[%c0_6, %c2, %c0_7, %c0_8] : memref<1x3x16x16xf32, #tpu.memory_space<vmem>>, vector<1x1x16x16xf32>
    %5 = vector.shape_cast %4 : vector<1x1x16x16xf32> to vector<16x16xf32>
    %cst = arith.constant 0.000000e+00 : f32
    %6 = vector.broadcast %cst : f32 to vector<3x20x60xf32>
    %c0_9 = arith.constant 0 : index
    %c0_10 = arith.constant 0 : index
    %c0_11 = arith.constant 0 : index
    %7 = vector.load %arg5[%c0_9, %c0_10, %c0_11] : memref<3x20x60xf32, #tpu.memory_space<vmem>>, vector<3x20x60xf32>
    tpu.vector_store %arg5[%c0_9, %c0_10, %c0_11], %6 {strides = array<i32>} : memref<3x20x60xf32, #tpu.memory_space<vmem>>, vector<3x20x60xf32>,
    %cst_12 = arith.constant 0.000000e+00 : f32
    %8 = vector.broadcast %cst_12 : f32 to vector<3x18x54xf32>
    %c0_13 = arith.constant 0 : index
    %c0_14 = arith.constant 0 : index
    %c0_15 = arith.constant 0 : index
    %9 = vector.load %arg6[%c0_13, %c0_14, %c0_15] : memref<3x18x54xf32, #tpu.memory_space<vmem>>, vector<3x18x54xf32>
    tpu.vector_store %arg6[%c0_13, %c0_14, %c0_15], %8 {strides = array<i32>} : memref<3x18x54xf32, #tpu.memory_space<vmem>>, vector<3x18x54xf32>,
    %c9 = arith.constant 9 : index
    %10 = memref.load %arg2[%c9] : memref<12xf32, #tpu.memory_space<smem>>
    %11 = vector.broadcast %10 : f32 to vector<16x16xf32>
    %c0_16 = arith.constant 0 : index
    %12 = memref.load %arg2[%c0_16] : memref<12xf32, #tpu.memory_space<smem>>
    %13 = vector.broadcast %12 : f32 to vector<16x16xf32>
    %14 = arith.mulf %13, %1 : vector<16x16xf32>
    %15 = arith.addf %11, %14 : vector<16x16xf32>
    %c1_17 = arith.constant 1 : index
    %16 = memref.load %arg2[%c1_17] : memref<12xf32, #tpu.memory_space<smem>>
    %17 = vector.broadcast %16 : f32 to vector<16x16xf32>
    %18 = arith.mulf %17, %3 : vector<16x16xf32>
    %19 = arith.addf %15, %18 : vector<16x16xf32>
    %c2_18 = arith.constant 2 : index
    %20 = memref.load %arg2[%c2_18] : memref<12xf32, #tpu.memory_space<smem>>
    %21 = vector.broadcast %20 : f32 to vector<16x16xf32>
    %22 = arith.mulf %21, %5 : vector<16x16xf32>
    %23 = arith.addf %19, %22 : vector<16x16xf32>
    %24 = vector.broadcast %10 : f32 to vector<18x18xf32>
    %c0_19 = arith.constant 0 : index
    %c1_20 = arith.constant 1 : index
    %c1_21 = arith.constant 1 : index
    %25 = vector.load %arg5[%c0_19, %c1_20, %c1_21] : memref<3x20x60xf32, #tpu.memory_space<vmem>>, vector<1x18x18xf32>
    %26 = vector.shape_cast %25 : vector<1x18x18xf32> to vector<18x18xf32>
    %27 = vector.shape_cast %24 : vector<18x18xf32> to vector<1x18x18xf32>
    tpu.vector_store %arg5[%c0_19, %c1_20, %c1_21], %27 {strides = array<i32>} : memref<3x20x60xf32, #tpu.memory_space<vmem>>, vector<1x18x18xf32>,
    %c0_22 = arith.constant 0 : index
    %c2_23 = arith.constant 2 : index
    %c2_24 = arith.constant 2 : index
    %28 = vector.load %arg5[%c0_22, %c2_23, %c2_24] : memref<3x20x60xf32, #tpu.memory_space<vmem>>, vector<1x16x16xf32>
    %29 = vector.shape_cast %28 : vector<1x16x16xf32> to vector<16x16xf32>
    %30 = vector.shape_cast %23 : vector<16x16xf32> to vector<1x16x16xf32>
    tpu.vector_store %arg5[%c0_22, %c2_23, %c2_24], %30 {strides = array<i32>} : memref<3x20x60xf32, #tpu.memory_space<vmem>>, vector<1x16x16xf32>,
    %c0_25 = arith.constant 0 : index
    %c1_26 = arith.constant 1 : index
    %c21 = arith.constant 21 : index
    %31 = vector.load %arg5[%c0_25, %c1_26, %c21] : memref<3x20x60xf32, #tpu.memory_space<vmem>>, vector<1x18x18xf32>
    %32 = vector.shape_cast %31 : vector<1x18x18xf32> to vector<18x18xf32>
    %33 = vector.shape_cast %24 : vector<18x18xf32> to vector<1x18x18xf32>
    tpu.vector_store %arg5[%c0_25, %c1_26, %c21], %33 {strides = array<i32>} : memref<3x20x60xf32, #tpu.memory_space<vmem>>, vector<1x18x18xf32>,
    %c0_27 = arith.constant 0 : index
    %c2_28 = arith.constant 2 : index
    %c22 = arith.constant 22 : index
    %34 = vector.load %arg5[%c0_27, %c2_28, %c22] : memref<3x20x60xf32, #tpu.memory_space<vmem>>, vector<1x16x16xf32>
    %35 = vector.shape_cast %34 : vector<1x16x16xf32> to vector<16x16xf32>
    %36 = vector.shape_cast %23 : vector<16x16xf32> to vector<1x16x16xf32>
    tpu.vector_store %arg5[%c0_27, %c2_28, %c22], %36 {strides = array<i32>} : memref<3x20x60xf32, #tpu.memory_space<vmem>>, vector<1x16x16xf32>,
    %c0_29 = arith.constant 0 : index
    %c1_30 = arith.constant 1 : index
    %c41 = arith.constant 41 : index
    %37 = vector.load %arg5[%c0_29, %c1_30, %c41] : memref<3x20x60xf32, #tpu.memory_space<vmem>>, vector<1x18x18xf32>
    %38 = vector.shape_cast %37 : vector<1x18x18xf32> to vector<18x18xf32>
    %39 = vector.shape_cast %24 : vector<18x18xf32> to vector<1x18x18xf32>
    tpu.vector_store %arg5[%c0_29, %c1_30, %c41], %39 {strides = array<i32>} : memref<3x20x60xf32, #tpu.memory_space<vmem>>, vector<1x18x18xf32>,
    %c0_31 = arith.constant 0 : index
    %c2_32 = arith.constant 2 : index
    %c42 = arith.constant 42 : index
    %40 = vector.load %arg5[%c0_31, %c2_32, %c42] : memref<3x20x60xf32, #tpu.memory_space<vmem>>, vector<1x16x16xf32>
    %41 = vector.shape_cast %40 : vector<1x16x16xf32> to vector<16x16xf32>
    %42 = vector.shape_cast %23 : vector<16x16xf32> to vector<1x16x16xf32>
    tpu.vector_store %arg5[%c0_31, %c2_32, %c42], %42 {strides = array<i32>} : memref<3x20x60xf32, #tpu.memory_space<vmem>>, vector<1x16x16xf32>,
    %c10 = arith.constant 10 : index
    %43 = memref.load %arg2[%c10] : memref<12xf32, #tpu.memory_space<smem>>
    %44 = vector.broadcast %43 : f32 to vector<16x16xf32>
    %c3 = arith.constant 3 : index
    %45 = memref.load %arg2[%c3] : memref<12xf32, #tpu.memory_space<smem>>
    %46 = vector.broadcast %45 : f32 to vector<16x16xf32>
    %47 = arith.mulf %46, %1 : vector<16x16xf32>
    %48 = arith.addf %44, %47 : vector<16x16xf32>
    %c4 = arith.constant 4 : index
    %49 = memref.load %arg2[%c4] : memref<12xf32, #tpu.memory_space<smem>>
    %50 = vector.broadcast %49 : f32 to vector<16x16xf32>
    %51 = arith.mulf %50, %3 : vector<16x16xf32>
    %52 = arith.addf %48, %51 : vector<16x16xf32>
    %c5 = arith.constant 5 : index
    %53 = memref.load %arg2[%c5] : memref<12xf32, #tpu.memory_space<smem>>
    %54 = vector.broadcast %53 : f32 to vector<16x16xf32>
    %55 = arith.mulf %54, %5 : vector<16x16xf32>
    %56 = arith.addf %52, %55 : vector<16x16xf32>
    %57 = vector.broadcast %43 : f32 to vector<18x18xf32>
    %c1_33 = arith.constant 1 : index
    %c1_34 = arith.constant 1 : index
    %c1_35 = arith.constant 1 : index
    %58 = vector.load %arg5[%c1_33, %c1_34, %c1_35] : memref<3x20x60xf32, #tpu.memory_space<vmem>>, vector<1x18x18xf32>
    %59 = vector.shape_cast %58 : vector<1x18x18xf32> to vector<18x18xf32>
    %60 = vector.shape_cast %57 : vector<18x18xf32> to vector<1x18x18xf32>
    tpu.vector_store %arg5[%c1_33, %c1_34, %c1_35], %60 {strides = array<i32>} : memref<3x20x60xf32, #tpu.memory_space<vmem>>, vector<1x18x18xf32>,
    %c1_36 = arith.constant 1 : index
    %c2_37 = arith.constant 2 : index
    %c2_38 = arith.constant 2 : index
    %61 = vector.load %arg5[%c1_36, %c2_37, %c2_38] : memref<3x20x60xf32, #tpu.memory_space<vmem>>, vector<1x16x16xf32>
    %62 = vector.shape_cast %61 : vector<1x16x16xf32> to vector<16x16xf32>
    %63 = vector.shape_cast %56 : vector<16x16xf32> to vector<1x16x16xf32>
    tpu.vector_store %arg5[%c1_36, %c2_37, %c2_38], %63 {strides = array<i32>} : memref<3x20x60xf32, #tpu.memory_space<vmem>>, vector<1x16x16xf32>,
    %c1_39 = arith.constant 1 : index
    %c1_40 = arith.constant 1 : index
    %c21_41 = arith.constant 21 : index
    %64 = vector.load %arg5[%c1_39, %c1_40, %c21_41] : memref<3x20x60xf32, #tpu.memory_space<vmem>>, vector<1x18x18xf32>
    %65 = vector.shape_cast %64 : vector<1x18x18xf32> to vector<18x18xf32>
    %66 = vector.shape_cast %57 : vector<18x18xf32> to vector<1x18x18xf32>
    tpu.vector_store %arg5[%c1_39, %c1_40, %c21_41], %66 {strides = array<i32>} : memref<3x20x60xf32, #tpu.memory_space<vmem>>, vector<1x18x18xf32>,
    %c1_42 = arith.constant 1 : index
    %c2_43 = arith.constant 2 : index
    %c22_44 = arith.constant 22 : index
    %67 = vector.load %arg5[%c1_42, %c2_43, %c22_44] : memref<3x20x60xf32, #tpu.memory_space<vmem>>, vector<1x16x16xf32>
    %68 = vector.shape_cast %67 : vector<1x16x16xf32> to vector<16x16xf32>
    %69 = vector.shape_cast %56 : vector<16x16xf32> to vector<1x16x16xf32>
    tpu.vector_store %arg5[%c1_42, %c2_43, %c22_44], %69 {strides = array<i32>} : memref<3x20x60xf32, #tpu.memory_space<vmem>>, vector<1x16x16xf32>,
    %c1_45 = arith.constant 1 : index
    %c1_46 = arith.constant 1 : index
    %c41_47 = arith.constant 41 : index
    %70 = vector.load %arg5[%c1_45, %c1_46, %c41_47] : memref<3x20x60xf32, #tpu.memory_space<vmem>>, vector<1x18x18xf32>
    %71 = vector.shape_cast %70 : vector<1x18x18xf32> to vector<18x18xf32>
    %72 = vector.shape_cast %57 : vector<18x18xf32> to vector<1x18x18xf32>
    tpu.vector_store %arg5[%c1_45, %c1_46, %c41_47], %72 {strides = array<i32>} : memref<3x20x60xf32, #tpu.memory_space<vmem>>, vector<1x18x18xf32>,
    %c1_48 = arith.constant 1 : index
    %c2_49 = arith.constant 2 : index
    %c42_50 = arith.constant 42 : index
    %73 = vector.load %arg5[%c1_48, %c2_49, %c42_50] : memref<3x20x60xf32, #tpu.memory_space<vmem>>, vector<1x16x16xf32>
    %74 = vector.shape_cast %73 : vector<1x16x16xf32> to vector<16x16xf32>
    %75 = vector.shape_cast %56 : vector<16x16xf32> to vector<1x16x16xf32>
    tpu.vector_store %arg5[%c1_48, %c2_49, %c42_50], %75 {strides = array<i32>} : memref<3x20x60xf32, #tpu.memory_space<vmem>>, vector<1x16x16xf32>,
    %c11 = arith.constant 11 : index
    %76 = memref.load %arg2[%c11] : memref<12xf32, #tpu.memory_space<smem>>
    %77 = vector.broadcast %76 : f32 to vector<16x16xf32>
    %c6 = arith.constant 6 : index
    %78 = memref.load %arg2[%c6] : memref<12xf32, #tpu.memory_space<smem>>
    %79 = vector.broadcast %78 : f32 to vector<16x16xf32>
    %80 = arith.mulf %79, %1 : vector<16x16xf32>
    %81 = arith.addf %77, %80 : vector<16x16xf32>
    %c7 = arith.constant 7 : index
    %82 = memref.load %arg2[%c7] : memref<12xf32, #tpu.memory_space<smem>>
    %83 = vector.broadcast %82 : f32 to vector<16x16xf32>
    %84 = arith.mulf %83, %3 : vector<16x16xf32>
    %85 = arith.addf %81, %84 : vector<16x16xf32>
    %c8 = arith.constant 8 : index
    %86 = memref.load %arg2[%c8] : memref<12xf32, #tpu.memory_space<smem>>
    %87 = vector.broadcast %86 : f32 to vector<16x16xf32>
    %88 = arith.mulf %87, %5 : vector<16x16xf32>
    %89 = arith.addf %85, %88 : vector<16x16xf32>
    %90 = vector.broadcast %76 : f32 to vector<18x18xf32>
    %c2_51 = arith.constant 2 : index
    %c1_52 = arith.constant 1 : index
    %c1_53 = arith.constant 1 : index
    %91 = vector.load %arg5[%c2_51, %c1_52, %c1_53] : memref<3x20x60xf32, #tpu.memory_space<vmem>>, vector<1x18x18xf32>
    %92 = vector.shape_cast %91 : vector<1x18x18xf32> to vector<18x18xf32>
    %93 = vector.shape_cast %90 : vector<18x18xf32> to vector<1x18x18xf32>
    tpu.vector_store %arg5[%c2_51, %c1_52, %c1_53], %93 {strides = array<i32>} : memref<3x20x60xf32, #tpu.memory_space<vmem>>, vector<1x18x18xf32>,
    %c2_54 = arith.constant 2 : index
    %c2_55 = arith.constant 2 : index
    %c2_56 = arith.constant 2 : index
    %94 = vector.load %arg5[%c2_54, %c2_55, %c2_56] : memref<3x20x60xf32, #tpu.memory_space<vmem>>, vector<1x16x16xf32>
    %95 = vector.shape_cast %94 : vector<1x16x16xf32> to vector<16x16xf32>
    %96 = vector.shape_cast %89 : vector<16x16xf32> to vector<1x16x16xf32>
    tpu.vector_store %arg5[%c2_54, %c2_55, %c2_56], %96 {strides = array<i32>} : memref<3x20x60xf32, #tpu.memory_space<vmem>>, vector<1x16x16xf32>,
    %c2_57 = arith.constant 2 : index
    %c1_58 = arith.constant 1 : index
    %c21_59 = arith.constant 21 : index
    %97 = vector.load %arg5[%c2_57, %c1_58, %c21_59] : memref<3x20x60xf32, #tpu.memory_space<vmem>>, vector<1x18x18xf32>
    %98 = vector.shape_cast %97 : vector<1x18x18xf32> to vector<18x18xf32>
    %99 = vector.shape_cast %90 : vector<18x18xf32> to vector<1x18x18xf32>
    tpu.vector_store %arg5[%c2_57, %c1_58, %c21_59], %99 {strides = array<i32>} : memref<3x20x60xf32, #tpu.memory_space<vmem>>, vector<1x18x18xf32>,
    %c2_60 = arith.constant 2 : index
    %c2_61 = arith.constant 2 : index
    %c22_62 = arith.constant 22 : index
    %100 = vector.load %arg5[%c2_60, %c2_61, %c22_62] : memref<3x20x60xf32, #tpu.memory_space<vmem>>, vector<1x16x16xf32>
    %101 = vector.shape_cast %100 : vector<1x16x16xf32> to vector<16x16xf32>
    %102 = vector.shape_cast %89 : vector<16x16xf32> to vector<1x16x16xf32>
    tpu.vector_store %arg5[%c2_60, %c2_61, %c22_62], %102 {strides = array<i32>} : memref<3x20x60xf32, #tpu.memory_space<vmem>>, vector<1x16x16xf32>,
    %c2_63 = arith.constant 2 : index
    %c1_64 = arith.constant 1 : index
    %c41_65 = arith.constant 41 : index
    %103 = vector.load %arg5[%c2_63, %c1_64, %c41_65] : memref<3x20x60xf32, #tpu.memory_space<vmem>>, vector<1x18x18xf32>
    %104 = vector.shape_cast %103 : vector<1x18x18xf32> to vector<18x18xf32>
    %105 = vector.shape_cast %90 : vector<18x18xf32> to vector<1x18x18xf32>
    tpu.vector_store %arg5[%c2_63, %c1_64, %c41_65], %105 {strides = array<i32>} : memref<3x20x60xf32, #tpu.memory_space<vmem>>, vector<1x18x18xf32>,
    %c2_66 = arith.constant 2 : index
    %c2_67 = arith.constant 2 : index
    %c42_68 = arith.constant 42 : index
    %106 = vector.load %arg5[%c2_66, %c2_67, %c42_68] : memref<3x20x60xf32, #tpu.memory_space<vmem>>, vector<1x16x16xf32>
    %107 = vector.shape_cast %106 : vector<1x16x16xf32> to vector<16x16xf32>
    %108 = vector.shape_cast %89 : vector<16x16xf32> to vector<1x16x16xf32>
    tpu.vector_store %arg5[%c2_66, %c2_67, %c42_68], %108 {strides = array<i32>} : memref<3x20x60xf32, #tpu.memory_space<vmem>>, vector<1x16x16xf32>,
    %c0_69 = arith.constant 0 : index
    %c0_70 = arith.constant 0 : index
    %109 = vector.load %arg3[%c0_69, %c0_70] : memref<56x56xf32, #tpu.memory_space<vmem>>, vector<1x56xf32>
    %c0_71 = arith.constant 0 : index
    %c0_72 = arith.constant 0 : index
    %c0_73 = arith.constant 0 : index
    %110 = vector.load %arg5[%c0_71, %c0_72, %c0_73] : memref<3x20x60xf32, #tpu.memory_space<vmem>>, vector<1x16x56xf32>
    %111 = vector.shape_cast %110 : vector<1x16x56xf32> to vector<16x56xf32>
    %112 = vector.broadcast %109 : vector<1x56xf32> to vector<16x56xf32>
    %113 = arith.mulf %112, %111 : vector<16x56xf32>
    %c1_74 = arith.constant 1 : index
    %c0_75 = arith.constant 0 : index
    %114 = vector.load %arg3[%c1_74, %c0_75] : memref<56x56xf32, #tpu.memory_space<vmem>>, vector<1x56xf32>
    %c0_76 = arith.constant 0 : index
    %c0_77 = arith.constant 0 : index
    %c2_78 = arith.constant 2 : index
    %115 = vector.load %arg5[%c0_76, %c0_77, %c2_78] : memref<3x20x60xf32, #tpu.memory_space<vmem>>, vector<1x16x56xf32>
    %116 = vector.shape_cast %115 : vector<1x16x56xf32> to vector<16x56xf32>
    %117 = vector.broadcast %114 : vector<1x56xf32> to vector<16x56xf32>
    %118 = arith.mulf %117, %116 : vector<16x56xf32>
    %119 = arith.addf %113, %118 : vector<16x56xf32>
    %c2_79 = arith.constant 2 : index
    %c0_80 = arith.constant 0 : index
    %120 = vector.load %arg3[%c2_79, %c0_80] : memref<56x56xf32, #tpu.memory_space<vmem>>, vector<1x56xf32>
    %c0_81 = arith.constant 0 : index
    %c0_82 = arith.constant 0 : index
    %c4_83 = arith.constant 4 : index
    %121 = vector.load %arg5[%c0_81, %c0_82, %c4_83] : memref<3x20x60xf32, #tpu.memory_space<vmem>>, vector<1x16x56xf32>
    %122 = vector.shape_cast %121 : vector<1x16x56xf32> to vector<16x56xf32>
    %123 = vector.broadcast %120 : vector<1x56xf32> to vector<16x56xf32>
    %124 = arith.mulf %123, %122 : vector<16x56xf32>
    %125 = arith.addf %119, %124 : vector<16x56xf32>
    %c3_84 = arith.constant 3 : index
    %c0_85 = arith.constant 0 : index
    %126 = vector.load %arg3[%c3_84, %c0_85] : memref<56x56xf32, #tpu.memory_space<vmem>>, vector<1x56xf32>
    %c0_86 = arith.constant 0 : index
    %c2_87 = arith.constant 2 : index
    %c0_88 = arith.constant 0 : index
    %127 = vector.load %arg5[%c0_86, %c2_87, %c0_88] : memref<3x20x60xf32, #tpu.memory_space<vmem>>, vector<1x16x56xf32>
    %128 = vector.shape_cast %127 : vector<1x16x56xf32> to vector<16x56xf32>
    %129 = vector.broadcast %126 : vector<1x56xf32> to vector<16x56xf32>
    %130 = arith.mulf %129, %128 : vector<16x56xf32>
    %131 = arith.addf %125, %130 : vector<16x56xf32>
    %c4_89 = arith.constant 4 : index
    %c0_90 = arith.constant 0 : index
    %132 = vector.load %arg3[%c4_89, %c0_90] : memref<56x56xf32, #tpu.memory_space<vmem>>, vector<1x56xf32>
    %c0_91 = arith.constant 0 : index
    %c2_92 = arith.constant 2 : index
    %c2_93 = arith.constant 2 : index
    %133 = vector.load %arg5[%c0_91, %c2_92, %c2_93] : memref<3x20x60xf32, #tpu.memory_space<vmem>>, vector<1x16x56xf32>
    %134 = vector.shape_cast %133 : vector<1x16x56xf32> to vector<16x56xf32>
    %135 = vector.broadcast %132 : vector<1x56xf32> to vector<16x56xf32>
    %136 = arith.mulf %135, %134 : vector<16x56xf32>
    %137 = arith.addf %131, %136 : vector<16x56xf32>
    %c5_94 = arith.constant 5 : index
    %c0_95 = arith.constant 0 : index
    %138 = vector.load %arg3[%c5_94, %c0_95] : memref<56x56xf32, #tpu.memory_space<vmem>>, vector<1x56xf32>
    %c0_96 = arith.constant 0 : index
    %c2_97 = arith.constant 2 : index
    %c4_98 = arith.constant 4 : index
    %139 = vector.load %arg5[%c0_96, %c2_97, %c4_98] : memref<3x20x60xf32, #tpu.memory_space<vmem>>, vector<1x16x56xf32>
    %140 = vector.shape_cast %139 : vector<1x16x56xf32> to vector<16x56xf32>
    %141 = vector.broadcast %138 : vector<1x56xf32> to vector<16x56xf32>
    %142 = arith.mulf %141, %140 : vector<16x56xf32>
    %143 = arith.addf %137, %142 : vector<16x56xf32>
    %c6_99 = arith.constant 6 : index
    %c0_100 = arith.constant 0 : index
    %144 = vector.load %arg3[%c6_99, %c0_100] : memref<56x56xf32, #tpu.memory_space<vmem>>, vector<1x56xf32>
    %c0_101 = arith.constant 0 : index
    %c4_102 = arith.constant 4 : index
    %c0_103 = arith.constant 0 : index
    %145 = vector.load %arg5[%c0_101, %c4_102, %c0_103] : memref<3x20x60xf32, #tpu.memory_space<vmem>>, vector<1x16x56xf32>
    %146 = vector.shape_cast %145 : vector<1x16x56xf32> to vector<16x56xf32>
    %147 = vector.broadcast %144 : vector<1x56xf32> to vector<16x56xf32>
    %148 = arith.mulf %147, %146 : vector<16x56xf32>
    %149 = arith.addf %143, %148 : vector<16x56xf32>
    %c7_104 = arith.constant 7 : index
    %c0_105 = arith.constant 0 : index
    %150 = vector.load %arg3[%c7_104, %c0_105] : memref<56x56xf32, #tpu.memory_space<vmem>>, vector<1x56xf32>
    %c0_106 = arith.constant 0 : index
    %c4_107 = arith.constant 4 : index
    %c2_108 = arith.constant 2 : index
    %151 = vector.load %arg5[%c0_106, %c4_107, %c2_108] : memref<3x20x60xf32, #tpu.memory_space<vmem>>, vector<1x16x56xf32>
    %152 = vector.shape_cast %151 : vector<1x16x56xf32> to vector<16x56xf32>
    %153 = vector.broadcast %150 : vector<1x56xf32> to vector<16x56xf32>
    %154 = arith.mulf %153, %152 : vector<16x56xf32>
    %155 = arith.addf %149, %154 : vector<16x56xf32>
    %c8_109 = arith.constant 8 : index
    %c0_110 = arith.constant 0 : index
    %156 = vector.load %arg3[%c8_109, %c0_110] : memref<56x56xf32, #tpu.memory_space<vmem>>, vector<1x56xf32>
    %c0_111 = arith.constant 0 : index
    %c4_112 = arith.constant 4 : index
    %c4_113 = arith.constant 4 : index
    %157 = vector.load %arg5[%c0_111, %c4_112, %c4_113] : memref<3x20x60xf32, #tpu.memory_space<vmem>>, vector<1x16x56xf32>
    %158 = vector.shape_cast %157 : vector<1x16x56xf32> to vector<16x56xf32>
    %159 = vector.broadcast %156 : vector<1x56xf32> to vector<16x56xf32>
    %160 = arith.mulf %159, %158 : vector<16x56xf32>
    %161 = arith.addf %155, %160 : vector<16x56xf32>
    %c9_114 = arith.constant 9 : index
    %c0_115 = arith.constant 0 : index
    %162 = vector.load %arg3[%c9_114, %c0_115] : memref<56x56xf32, #tpu.memory_space<vmem>>, vector<1x56xf32>
    %c1_116 = arith.constant 1 : index
    %c0_117 = arith.constant 0 : index
    %c0_118 = arith.constant 0 : index
    %163 = vector.load %arg5[%c1_116, %c0_117, %c0_118] : memref<3x20x60xf32, #tpu.memory_space<vmem>>, vector<1x16x56xf32>
    %164 = vector.shape_cast %163 : vector<1x16x56xf32> to vector<16x56xf32>
    %165 = vector.broadcast %162 : vector<1x56xf32> to vector<16x56xf32>
    %166 = arith.mulf %165, %164 : vector<16x56xf32>
    %c10_119 = arith.constant 10 : index
    %c0_120 = arith.constant 0 : index
    %167 = vector.load %arg3[%c10_119, %c0_120] : memref<56x56xf32, #tpu.memory_space<vmem>>, vector<1x56xf32>
    %c1_121 = arith.constant 1 : index
    %c0_122 = arith.constant 0 : index
    %c2_123 = arith.constant 2 : index
    %168 = vector.load %arg5[%c1_121, %c0_122, %c2_123] : memref<3x20x60xf32, #tpu.memory_space<vmem>>, vector<1x16x56xf32>
    %169 = vector.shape_cast %168 : vector<1x16x56xf32> to vector<16x56xf32>
    %170 = vector.broadcast %167 : vector<1x56xf32> to vector<16x56xf32>
    %171 = arith.mulf %170, %169 : vector<16x56xf32>
    %172 = arith.addf %166, %171 : vector<16x56xf32>
    %c11_124 = arith.constant 11 : index
    %c0_125 = arith.constant 0 : index
    %173 = vector.load %arg3[%c11_124, %c0_125] : memref<56x56xf32, #tpu.memory_space<vmem>>, vector<1x56xf32>
    %c1_126 = arith.constant 1 : index
    %c0_127 = arith.constant 0 : index
    %c4_128 = arith.constant 4 : index
    %174 = vector.load %arg5[%c1_126, %c0_127, %c4_128] : memref<3x20x60xf32, #tpu.memory_space<vmem>>, vector<1x16x56xf32>
    %175 = vector.shape_cast %174 : vector<1x16x56xf32> to vector<16x56xf32>
    %176 = vector.broadcast %173 : vector<1x56xf32> to vector<16x56xf32>
    %177 = arith.mulf %176, %175 : vector<16x56xf32>
    %178 = arith.addf %172, %177 : vector<16x56xf32>
    %c12 = arith.constant 12 : index
    %c0_129 = arith.constant 0 : index
    %179 = vector.load %arg3[%c12, %c0_129] : memref<56x56xf32, #tpu.memory_space<vmem>>, vector<1x56xf32>
    %c1_130 = arith.constant 1 : index
    %c2_131 = arith.constant 2 : index
    %c0_132 = arith.constant 0 : index
    %180 = vector.load %arg5[%c1_130, %c2_131, %c0_132] : memref<3x20x60xf32, #tpu.memory_space<vmem>>, vector<1x16x56xf32>
    %181 = vector.shape_cast %180 : vector<1x16x56xf32> to vector<16x56xf32>
    %182 = vector.broadcast %179 : vector<1x56xf32> to vector<16x56xf32>
    %183 = arith.mulf %182, %181 : vector<16x56xf32>
    %184 = arith.addf %178, %183 : vector<16x56xf32>
    %c13 = arith.constant 13 : index
    %c0_133 = arith.constant 0 : index
    %185 = vector.load %arg3[%c13, %c0_133] : memref<56x56xf32, #tpu.memory_space<vmem>>, vector<1x56xf32>
    %c1_134 = arith.constant 1 : index
    %c2_135 = arith.constant 2 : index
    %c2_136 = arith.constant 2 : index
    %186 = vector.load %arg5[%c1_134, %c2_135, %c2_136] : memref<3x20x60xf32, #tpu.memory_space<vmem>>, vector<1x16x56xf32>
    %187 = vector.shape_cast %186 : vector<1x16x56xf32> to vector<16x56xf32>
    %188 = vector.broadcast %185 : vector<1x56xf32> to vector<16x56xf32>
    %189 = arith.mulf %188, %187 : vector<16x56xf32>
    %190 = arith.addf %184, %189 : vector<16x56xf32>
    %c14 = arith.constant 14 : index
    %c0_137 = arith.constant 0 : index
    %191 = vector.load %arg3[%c14, %c0_137] : memref<56x56xf32, #tpu.memory_space<vmem>>, vector<1x56xf32>
    %c1_138 = arith.constant 1 : index
    %c2_139 = arith.constant 2 : index
    %c4_140 = arith.constant 4 : index
    %192 = vector.load %arg5[%c1_138, %c2_139, %c4_140] : memref<3x20x60xf32, #tpu.memory_space<vmem>>, vector<1x16x56xf32>
    %193 = vector.shape_cast %192 : vector<1x16x56xf32> to vector<16x56xf32>
    %194 = vector.broadcast %191 : vector<1x56xf32> to vector<16x56xf32>
    %195 = arith.mulf %194, %193 : vector<16x56xf32>
    %196 = arith.addf %190, %195 : vector<16x56xf32>
    %c15 = arith.constant 15 : index
    %c0_141 = arith.constant 0 : index
    %197 = vector.load %arg3[%c15, %c0_141] : memref<56x56xf32, #tpu.memory_space<vmem>>, vector<1x56xf32>
    %c1_142 = arith.constant 1 : index
    %c4_143 = arith.constant 4 : index
    %c0_144 = arith.constant 0 : index
    %198 = vector.load %arg5[%c1_142, %c4_143, %c0_144] : memref<3x20x60xf32, #tpu.memory_space<vmem>>, vector<1x16x56xf32>
    %199 = vector.shape_cast %198 : vector<1x16x56xf32> to vector<16x56xf32>
    %200 = vector.broadcast %197 : vector<1x56xf32> to vector<16x56xf32>
    %201 = arith.mulf %200, %199 : vector<16x56xf32>
    %202 = arith.addf %196, %201 : vector<16x56xf32>
    %c16 = arith.constant 16 : index
    %c0_145 = arith.constant 0 : index
    %203 = vector.load %arg3[%c16, %c0_145] : memref<56x56xf32, #tpu.memory_space<vmem>>, vector<1x56xf32>
    %c1_146 = arith.constant 1 : index
    %c4_147 = arith.constant 4 : index
    %c2_148 = arith.constant 2 : index
    %204 = vector.load %arg5[%c1_146, %c4_147, %c2_148] : memref<3x20x60xf32, #tpu.memory_space<vmem>>, vector<1x16x56xf32>
    %205 = vector.shape_cast %204 : vector<1x16x56xf32> to vector<16x56xf32>
    %206 = vector.broadcast %203 : vector<1x56xf32> to vector<16x56xf32>
    %207 = arith.mulf %206, %205 : vector<16x56xf32>
    %208 = arith.addf %202, %207 : vector<16x56xf32>
    %c17 = arith.constant 17 : index
    %c0_149 = arith.constant 0 : index
    %209 = vector.load %arg3[%c17, %c0_149] : memref<56x56xf32, #tpu.memory_space<vmem>>, vector<1x56xf32>
    %c1_150 = arith.constant 1 : index
    %c4_151 = arith.constant 4 : index
    %c4_152 = arith.constant 4 : index
    %210 = vector.load %arg5[%c1_150, %c4_151, %c4_152] : memref<3x20x60xf32, #tpu.memory_space<vmem>>, vector<1x16x56xf32>
    %211 = vector.shape_cast %210 : vector<1x16x56xf32> to vector<16x56xf32>
    %212 = vector.broadcast %209 : vector<1x56xf32> to vector<16x56xf32>
    %213 = arith.mulf %212, %211 : vector<16x56xf32>
    %214 = arith.addf %208, %213 : vector<16x56xf32>
    %c18 = arith.constant 18 : index
    %c0_153 = arith.constant 0 : index
    %215 = vector.load %arg3[%c18, %c0_153] : memref<56x56xf32, #tpu.memory_space<vmem>>, vector<1x56xf32>
    %c2_154 = arith.constant 2 : index
    %c0_155 = arith.constant 0 : index
    %c0_156 = arith.constant 0 : index
    %216 = vector.load %arg5[%c2_154, %c0_155, %c0_156] : memref<3x20x60xf32, #tpu.memory_space<vmem>>, vector<1x16x56xf32>
    %217 = vector.shape_cast %216 : vector<1x16x56xf32> to vector<16x56xf32>
    %218 = vector.broadcast %215 : vector<1x56xf32> to vector<16x56xf32>
    %219 = arith.mulf %218, %217 : vector<16x56xf32>
    %c19 = arith.constant 19 : index
    %c0_157 = arith.constant 0 : index
    %220 = vector.load %arg3[%c19, %c0_157] : memref<56x56xf32, #tpu.memory_space<vmem>>, vector<1x56xf32>
    %c2_158 = arith.constant 2 : index
    %c0_159 = arith.constant 0 : index
    %c2_160 = arith.constant 2 : index
    %221 = vector.load %arg5[%c2_158, %c0_159, %c2_160] : memref<3x20x60xf32, #tpu.memory_space<vmem>>, vector<1x16x56xf32>
    %222 = vector.shape_cast %221 : vector<1x16x56xf32> to vector<16x56xf32>
    %223 = vector.broadcast %220 : vector<1x56xf32> to vector<16x56xf32>
    %224 = arith.mulf %223, %222 : vector<16x56xf32>
    %225 = arith.addf %219, %224 : vector<16x56xf32>
    %c20 = arith.constant 20 : index
    %c0_161 = arith.constant 0 : index
    %226 = vector.load %arg3[%c20, %c0_161] : memref<56x56xf32, #tpu.memory_space<vmem>>, vector<1x56xf32>
    %c2_162 = arith.constant 2 : index
    %c0_163 = arith.constant 0 : index
    %c4_164 = arith.constant 4 : index
    %227 = vector.load %arg5[%c2_162, %c0_163, %c4_164] : memref<3x20x60xf32, #tpu.memory_space<vmem>>, vector<1x16x56xf32>
    %228 = vector.shape_cast %227 : vector<1x16x56xf32> to vector<16x56xf32>
    %229 = vector.broadcast %226 : vector<1x56xf32> to vector<16x56xf32>
    %230 = arith.mulf %229, %228 : vector<16x56xf32>
    %231 = arith.addf %225, %230 : vector<16x56xf32>
    %c21_165 = arith.constant 21 : index
    %c0_166 = arith.constant 0 : index
    %232 = vector.load %arg3[%c21_165, %c0_166] : memref<56x56xf32, #tpu.memory_space<vmem>>, vector<1x56xf32>
    %c2_167 = arith.constant 2 : index
    %c2_168 = arith.constant 2 : index
    %c0_169 = arith.constant 0 : index
    %233 = vector.load %arg5[%c2_167, %c2_168, %c0_169] : memref<3x20x60xf32, #tpu.memory_space<vmem>>, vector<1x16x56xf32>
    %234 = vector.shape_cast %233 : vector<1x16x56xf32> to vector<16x56xf32>
    %235 = vector.broadcast %232 : vector<1x56xf32> to vector<16x56xf32>
    %236 = arith.mulf %235, %234 : vector<16x56xf32>
    %237 = arith.addf %231, %236 : vector<16x56xf32>
    %c22_170 = arith.constant 22 : index
    %c0_171 = arith.constant 0 : index
    %238 = vector.load %arg3[%c22_170, %c0_171] : memref<56x56xf32, #tpu.memory_space<vmem>>, vector<1x56xf32>
    %c2_172 = arith.constant 2 : index
    %c2_173 = arith.constant 2 : index
    %c2_174 = arith.constant 2 : index
    %239 = vector.load %arg5[%c2_172, %c2_173, %c2_174] : memref<3x20x60xf32, #tpu.memory_space<vmem>>, vector<1x16x56xf32>
    %240 = vector.shape_cast %239 : vector<1x16x56xf32> to vector<16x56xf32>
    %241 = vector.broadcast %238 : vector<1x56xf32> to vector<16x56xf32>
    %242 = arith.mulf %241, %240 : vector<16x56xf32>
    %243 = arith.addf %237, %242 : vector<16x56xf32>
    %c23 = arith.constant 23 : index
    %c0_175 = arith.constant 0 : index
    %244 = vector.load %arg3[%c23, %c0_175] : memref<56x56xf32, #tpu.memory_space<vmem>>, vector<1x56xf32>
    %c2_176 = arith.constant 2 : index
    %c2_177 = arith.constant 2 : index
    %c4_178 = arith.constant 4 : index
    %245 = vector.load %arg5[%c2_176, %c2_177, %c4_178] : memref<3x20x60xf32, #tpu.memory_space<vmem>>, vector<1x16x56xf32>
    %246 = vector.shape_cast %245 : vector<1x16x56xf32> to vector<16x56xf32>
    %247 = vector.broadcast %244 : vector<1x56xf32> to vector<16x56xf32>
    %248 = arith.mulf %247, %246 : vector<16x56xf32>
    %249 = arith.addf %243, %248 : vector<16x56xf32>
    %c24 = arith.constant 24 : index
    %c0_179 = arith.constant 0 : index
    %250 = vector.load %arg3[%c24, %c0_179] : memref<56x56xf32, #tpu.memory_space<vmem>>, vector<1x56xf32>
    %c2_180 = arith.constant 2 : index
    %c4_181 = arith.constant 4 : index
    %c0_182 = arith.constant 0 : index
    %251 = vector.load %arg5[%c2_180, %c4_181, %c0_182] : memref<3x20x60xf32, #tpu.memory_space<vmem>>, vector<1x16x56xf32>
    %252 = vector.shape_cast %251 : vector<1x16x56xf32> to vector<16x56xf32>
    %253 = vector.broadcast %250 : vector<1x56xf32> to vector<16x56xf32>
    %254 = arith.mulf %253, %252 : vector<16x56xf32>
    %255 = arith.addf %249, %254 : vector<16x56xf32>
    %c25 = arith.constant 25 : index
    %c0_183 = arith.constant 0 : index
    %256 = vector.load %arg3[%c25, %c0_183] : memref<56x56xf32, #tpu.memory_space<vmem>>, vector<1x56xf32>
    %c2_184 = arith.constant 2 : index
    %c4_185 = arith.constant 4 : index
    %c2_186 = arith.constant 2 : index
    %257 = vector.load %arg5[%c2_184, %c4_185, %c2_186] : memref<3x20x60xf32, #tpu.memory_space<vmem>>, vector<1x16x56xf32>
    %258 = vector.shape_cast %257 : vector<1x16x56xf32> to vector<16x56xf32>
    %259 = vector.broadcast %256 : vector<1x56xf32> to vector<16x56xf32>
    %260 = arith.mulf %259, %258 : vector<16x56xf32>
    %261 = arith.addf %255, %260 : vector<16x56xf32>
    %c26 = arith.constant 26 : index
    %c0_187 = arith.constant 0 : index
    %262 = vector.load %arg3[%c26, %c0_187] : memref<56x56xf32, #tpu.memory_space<vmem>>, vector<1x56xf32>
    %c2_188 = arith.constant 2 : index
    %c4_189 = arith.constant 4 : index
    %c4_190 = arith.constant 4 : index
    %263 = vector.load %arg5[%c2_188, %c4_189, %c4_190] : memref<3x20x60xf32, #tpu.memory_space<vmem>>, vector<1x16x56xf32>
    %264 = vector.shape_cast %263 : vector<1x16x56xf32> to vector<16x56xf32>
    %265 = vector.broadcast %262 : vector<1x56xf32> to vector<16x56xf32>
    %266 = arith.mulf %265, %264 : vector<16x56xf32>
    %267 = arith.addf %261, %266 : vector<16x56xf32>
    %268 = arith.addf %161, %214 : vector<16x56xf32>
    %c27 = arith.constant 27 : index
    %c0_191 = arith.constant 0 : index
    %269 = vector.load %arg3[%c27, %c0_191] : memref<56x56xf32, #tpu.memory_space<vmem>>, vector<1x56xf32>
    %270 = vector.broadcast %269 : vector<1x56xf32> to vector<16x56xf32>
    %271 = arith.addf %267, %270 : vector<16x56xf32>
    %272 = arith.addf %268, %271 : vector<16x56xf32>
    %273 = vector.extract_strided_slice %272 {offsets = [0, 0], sizes = [16, 16], strides = [1, 1]} : vector<16x56xf32> to vector<16x16xf32>
    %c0_192 = arith.constant 0 : index
    %c1_193 = arith.constant 1 : index
    %c1_194 = arith.constant 1 : index
    %274 = vector.load %arg6[%c0_192, %c1_193, %c1_194] : memref<3x18x54xf32, #tpu.memory_space<vmem>>, vector<1x16x16xf32>
    %275 = vector.shape_cast %274 : vector<1x16x16xf32> to vector<16x16xf32>
    %276 = vector.shape_cast %273 : vector<16x16xf32> to vector<1x16x16xf32>
    tpu.vector_store %arg6[%c0_192, %c1_193, %c1_194], %276 {strides = array<i32>} : memref<3x18x54xf32, #tpu.memory_space<vmem>>, vector<1x16x16xf32>,
    %c0_195 = arith.constant 0 : index
    %c1_196 = arith.constant 1 : index
    %c19_197 = arith.constant 19 : index
    %277 = vector.load %arg6[%c0_195, %c1_196, %c19_197] : memref<3x18x54xf32, #tpu.memory_space<vmem>>, vector<1x16x16xf32>
    %278 = vector.shape_cast %277 : vector<1x16x16xf32> to vector<16x16xf32>
    %279 = vector.shape_cast %273 : vector<16x16xf32> to vector<1x16x16xf32>
    tpu.vector_store %arg6[%c0_195, %c1_196, %c19_197], %279 {strides = array<i32>} : memref<3x18x54xf32, #tpu.memory_space<vmem>>, vector<1x16x16xf32>,
    %c0_198 = arith.constant 0 : index
    %c1_199 = arith.constant 1 : index
    %c37 = arith.constant 37 : index
    %280 = vector.load %arg6[%c0_198, %c1_199, %c37] : memref<3x18x54xf32, #tpu.memory_space<vmem>>, vector<1x16x16xf32>
    %281 = vector.shape_cast %280 : vector<1x16x16xf32> to vector<16x16xf32>
    %282 = vector.shape_cast %273 : vector<16x16xf32> to vector<1x16x16xf32>
    tpu.vector_store %arg6[%c0_198, %c1_199, %c37], %282 {strides = array<i32>} : memref<3x18x54xf32, #tpu.memory_space<vmem>>, vector<1x16x16xf32>,
    %283 = vector.extract_strided_slice %272 {offsets = [0, 20], sizes = [16, 16], strides = [1, 1]} : vector<16x56xf32> to vector<16x16xf32>
    %c1_200 = arith.constant 1 : index
    %c1_201 = arith.constant 1 : index
    %c1_202 = arith.constant 1 : index
    %284 = vector.load %arg6[%c1_200, %c1_201, %c1_202] : memref<3x18x54xf32, #tpu.memory_space<vmem>>, vector<1x16x16xf32>
    %285 = vector.shape_cast %284 : vector<1x16x16xf32> to vector<16x16xf32>
    %286 = vector.shape_cast %283 : vector<16x16xf32> to vector<1x16x16xf32>
    tpu.vector_store %arg6[%c1_200, %c1_201, %c1_202], %286 {strides = array<i32>} : memref<3x18x54xf32, #tpu.memory_space<vmem>>, vector<1x16x16xf32>,
    %c1_203 = arith.constant 1 : index
    %c1_204 = arith.constant 1 : index
    %c19_205 = arith.constant 19 : index
    %287 = vector.load %arg6[%c1_203, %c1_204, %c19_205] : memref<3x18x54xf32, #tpu.memory_space<vmem>>, vector<1x16x16xf32>
    %288 = vector.shape_cast %287 : vector<1x16x16xf32> to vector<16x16xf32>
    %289 = vector.shape_cast %283 : vector<16x16xf32> to vector<1x16x16xf32>
    tpu.vector_store %arg6[%c1_203, %c1_204, %c19_205], %289 {strides = array<i32>} : memref<3x18x54xf32, #tpu.memory_space<vmem>>, vector<1x16x16xf32>,
    %c1_206 = arith.constant 1 : index
    %c1_207 = arith.constant 1 : index
    %c37_208 = arith.constant 37 : index
    %290 = vector.load %arg6[%c1_206, %c1_207, %c37_208] : memref<3x18x54xf32, #tpu.memory_space<vmem>>, vector<1x16x16xf32>
    %291 = vector.shape_cast %290 : vector<1x16x16xf32> to vector<16x16xf32>
    %292 = vector.shape_cast %283 : vector<16x16xf32> to vector<1x16x16xf32>
    tpu.vector_store %arg6[%c1_206, %c1_207, %c37_208], %292 {strides = array<i32>} : memref<3x18x54xf32, #tpu.memory_space<vmem>>, vector<1x16x16xf32>,
    %293 = vector.extract_strided_slice %272 {offsets = [0, 40], sizes = [16, 16], strides = [1, 1]} : vector<16x56xf32> to vector<16x16xf32>
    %c2_209 = arith.constant 2 : index
    %c1_210 = arith.constant 1 : index
    %c1_211 = arith.constant 1 : index
    %294 = vector.load %arg6[%c2_209, %c1_210, %c1_211] : memref<3x18x54xf32, #tpu.memory_space<vmem>>, vector<1x16x16xf32>
    %295 = vector.shape_cast %294 : vector<1x16x16xf32> to vector<16x16xf32>
    %296 = vector.shape_cast %293 : vector<16x16xf32> to vector<1x16x16xf32>
    tpu.vector_store %arg6[%c2_209, %c1_210, %c1_211], %296 {strides = array<i32>} : memref<3x18x54xf32, #tpu.memory_space<vmem>>, vector<1x16x16xf32>,
    %c2_212 = arith.constant 2 : index
    %c1_213 = arith.constant 1 : index
    %c19_214 = arith.constant 19 : index
    %297 = vector.load %arg6[%c2_212, %c1_213, %c19_214] : memref<3x18x54xf32, #tpu.memory_space<vmem>>, vector<1x16x16xf32>
    %298 = vector.shape_cast %297 : vector<1x16x16xf32> to vector<16x16xf32>
    %299 = vector.shape_cast %293 : vector<16x16xf32> to vector<1x16x16xf32>
    tpu.vector_store %arg6[%c2_212, %c1_213, %c19_214], %299 {strides = array<i32>} : memref<3x18x54xf32, #tpu.memory_space<vmem>>, vector<1x16x16xf32>,
    %c2_215 = arith.constant 2 : index
    %c1_216 = arith.constant 1 : index
    %c37_217 = arith.constant 37 : index
    %300 = vector.load %arg6[%c2_215, %c1_216, %c37_217] : memref<3x18x54xf32, #tpu.memory_space<vmem>>, vector<1x16x16xf32>
    %301 = vector.shape_cast %300 : vector<1x16x16xf32> to vector<16x16xf32>
    %302 = vector.shape_cast %293 : vector<16x16xf32> to vector<1x16x16xf32>
    tpu.vector_store %arg6[%c2_215, %c1_216, %c37_217], %302 {strides = array<i32>} : memref<3x18x54xf32, #tpu.memory_space<vmem>>, vector<1x16x16xf32>,
    %c28 = arith.constant 28 : index
    %c0_218 = arith.constant 0 : index
    %303 = vector.load %arg3[%c28, %c0_218] : memref<56x56xf32, #tpu.memory_space<vmem>>, vector<1x50xf32>
    %c0_219 = arith.constant 0 : index
    %c0_220 = arith.constant 0 : index
    %c0_221 = arith.constant 0 : index
    %304 = vector.load %arg6[%c0_219, %c0_220, %c0_221] : memref<3x18x54xf32, #tpu.memory_space<vmem>>, vector<1x14x50xf32>
    %305 = vector.shape_cast %304 : vector<1x14x50xf32> to vector<14x50xf32>
    %306 = vector.broadcast %303 : vector<1x50xf32> to vector<14x50xf32>
    %307 = arith.mulf %306, %305 : vector<14x50xf32>
    %c29 = arith.constant 29 : index
    %c0_222 = arith.constant 0 : index
    %308 = vector.load %arg3[%c29, %c0_222] : memref<56x56xf32, #tpu.memory_space<vmem>>, vector<1x50xf32>
    %c0_223 = arith.constant 0 : index
    %c0_224 = arith.constant 0 : index
    %c2_225 = arith.constant 2 : index
    %309 = vector.load %arg6[%c0_223, %c0_224, %c2_225] : memref<3x18x54xf32, #tpu.memory_space<vmem>>, vector<1x14x50xf32>
    %310 = vector.shape_cast %309 : vector<1x14x50xf32> to vector<14x50xf32>
    %311 = vector.broadcast %308 : vector<1x50xf32> to vector<14x50xf32>
    %312 = arith.mulf %311, %310 : vector<14x50xf32>
    %313 = arith.addf %307, %312 : vector<14x50xf32>
    %c30 = arith.constant 30 : index
    %c0_226 = arith.constant 0 : index
    %314 = vector.load %arg3[%c30, %c0_226] : memref<56x56xf32, #tpu.memory_space<vmem>>, vector<1x50xf32>
    %c0_227 = arith.constant 0 : index
    %c0_228 = arith.constant 0 : index
    %c4_229 = arith.constant 4 : index
    %315 = vector.load %arg6[%c0_227, %c0_228, %c4_229] : memref<3x18x54xf32, #tpu.memory_space<vmem>>, vector<1x14x50xf32>
    %316 = vector.shape_cast %315 : vector<1x14x50xf32> to vector<14x50xf32>
    %317 = vector.broadcast %314 : vector<1x50xf32> to vector<14x50xf32>
    %318 = arith.mulf %317, %316 : vector<14x50xf32>
    %319 = arith.addf %313, %318 : vector<14x50xf32>
    %c31 = arith.constant 31 : index
    %c0_230 = arith.constant 0 : index
    %320 = vector.load %arg3[%c31, %c0_230] : memref<56x56xf32, #tpu.memory_space<vmem>>, vector<1x50xf32>
    %c0_231 = arith.constant 0 : index
    %c2_232 = arith.constant 2 : index
    %c0_233 = arith.constant 0 : index
    %321 = vector.load %arg6[%c0_231, %c2_232, %c0_233] : memref<3x18x54xf32, #tpu.memory_space<vmem>>, vector<1x14x50xf32>
    %322 = vector.shape_cast %321 : vector<1x14x50xf32> to vector<14x50xf32>
    %323 = vector.broadcast %320 : vector<1x50xf32> to vector<14x50xf32>
    %324 = arith.mulf %323, %322 : vector<14x50xf32>
    %325 = arith.addf %319, %324 : vector<14x50xf32>
    %c32 = arith.constant 32 : index
    %c0_234 = arith.constant 0 : index
    %326 = vector.load %arg3[%c32, %c0_234] : memref<56x56xf32, #tpu.memory_space<vmem>>, vector<1x50xf32>
    %c0_235 = arith.constant 0 : index
    %c2_236 = arith.constant 2 : index
    %c2_237 = arith.constant 2 : index
    %327 = vector.load %arg6[%c0_235, %c2_236, %c2_237] : memref<3x18x54xf32, #tpu.memory_space<vmem>>, vector<1x14x50xf32>
    %328 = vector.shape_cast %327 : vector<1x14x50xf32> to vector<14x50xf32>
    %329 = vector.broadcast %326 : vector<1x50xf32> to vector<14x50xf32>
    %330 = arith.mulf %329, %328 : vector<14x50xf32>
    %331 = arith.addf %325, %330 : vector<14x50xf32>
    %c33 = arith.constant 33 : index
    %c0_238 = arith.constant 0 : index
    %332 = vector.load %arg3[%c33, %c0_238] : memref<56x56xf32, #tpu.memory_space<vmem>>, vector<1x50xf32>
    %c0_239 = arith.constant 0 : index
    %c2_240 = arith.constant 2 : index
    %c4_241 = arith.constant 4 : index
    %333 = vector.load %arg6[%c0_239, %c2_240, %c4_241] : memref<3x18x54xf32, #tpu.memory_space<vmem>>, vector<1x14x50xf32>
    %334 = vector.shape_cast %333 : vector<1x14x50xf32> to vector<14x50xf32>
    %335 = vector.broadcast %332 : vector<1x50xf32> to vector<14x50xf32>
    %336 = arith.mulf %335, %334 : vector<14x50xf32>
    %337 = arith.addf %331, %336 : vector<14x50xf32>
    %c34 = arith.constant 34 : index
    %c0_242 = arith.constant 0 : index
    %338 = vector.load %arg3[%c34, %c0_242] : memref<56x56xf32, #tpu.memory_space<vmem>>, vector<1x50xf32>
    %c0_243 = arith.constant 0 : index
    %c4_244 = arith.constant 4 : index
    %c0_245 = arith.constant 0 : index
    %339 = vector.load %arg6[%c0_243, %c4_244, %c0_245] : memref<3x18x54xf32, #tpu.memory_space<vmem>>, vector<1x14x50xf32>
    %340 = vector.shape_cast %339 : vector<1x14x50xf32> to vector<14x50xf32>
    %341 = vector.broadcast %338 : vector<1x50xf32> to vector<14x50xf32>
    %342 = arith.mulf %341, %340 : vector<14x50xf32>
    %343 = arith.addf %337, %342 : vector<14x50xf32>
    %c35 = arith.constant 35 : index
    %c0_246 = arith.constant 0 : index
    %344 = vector.load %arg3[%c35, %c0_246] : memref<56x56xf32, #tpu.memory_space<vmem>>, vector<1x50xf32>
    %c0_247 = arith.constant 0 : index
    %c4_248 = arith.constant 4 : index
    %c2_249 = arith.constant 2 : index
    %345 = vector.load %arg6[%c0_247, %c4_248, %c2_249] : memref<3x18x54xf32, #tpu.memory_space<vmem>>, vector<1x14x50xf32>
    %346 = vector.shape_cast %345 : vector<1x14x50xf32> to vector<14x50xf32>
    %347 = vector.broadcast %344 : vector<1x50xf32> to vector<14x50xf32>
    %348 = arith.mulf %347, %346 : vector<14x50xf32>
    %349 = arith.addf %343, %348 : vector<14x50xf32>
    %c36 = arith.constant 36 : index
    %c0_250 = arith.constant 0 : index
    %350 = vector.load %arg3[%c36, %c0_250] : memref<56x56xf32, #tpu.memory_space<vmem>>, vector<1x50xf32>
    %c0_251 = arith.constant 0 : index
    %c4_252 = arith.constant 4 : index
    %c4_253 = arith.constant 4 : index
    %351 = vector.load %arg6[%c0_251, %c4_252, %c4_253] : memref<3x18x54xf32, #tpu.memory_space<vmem>>, vector<1x14x50xf32>
    %352 = vector.shape_cast %351 : vector<1x14x50xf32> to vector<14x50xf32>
    %353 = vector.broadcast %350 : vector<1x50xf32> to vector<14x50xf32>
    %354 = arith.mulf %353, %352 : vector<14x50xf32>
    %355 = arith.addf %349, %354 : vector<14x50xf32>
    %c37_254 = arith.constant 37 : index
    %c0_255 = arith.constant 0 : index
    %356 = vector.load %arg3[%c37_254, %c0_255] : memref<56x56xf32, #tpu.memory_space<vmem>>, vector<1x50xf32>
    %c1_256 = arith.constant 1 : index
    %c0_257 = arith.constant 0 : index
    %c0_258 = arith.constant 0 : index
    %357 = vector.load %arg6[%c1_256, %c0_257, %c0_258] : memref<3x18x54xf32, #tpu.memory_space<vmem>>, vector<1x14x50xf32>
    %358 = vector.shape_cast %357 : vector<1x14x50xf32> to vector<14x50xf32>
    %359 = vector.broadcast %356 : vector<1x50xf32> to vector<14x50xf32>
    %360 = arith.mulf %359, %358 : vector<14x50xf32>
    %c38 = arith.constant 38 : index
    %c0_259 = arith.constant 0 : index
    %361 = vector.load %arg3[%c38, %c0_259] : memref<56x56xf32, #tpu.memory_space<vmem>>, vector<1x50xf32>
    %c1_260 = arith.constant 1 : index
    %c0_261 = arith.constant 0 : index
    %c2_262 = arith.constant 2 : index
    %362 = vector.load %arg6[%c1_260, %c0_261, %c2_262] : memref<3x18x54xf32, #tpu.memory_space<vmem>>, vector<1x14x50xf32>
    %363 = vector.shape_cast %362 : vector<1x14x50xf32> to vector<14x50xf32>
    %364 = vector.broadcast %361 : vector<1x50xf32> to vector<14x50xf32>
    %365 = arith.mulf %364, %363 : vector<14x50xf32>
    %366 = arith.addf %360, %365 : vector<14x50xf32>
    %c39 = arith.constant 39 : index
    %c0_263 = arith.constant 0 : index
    %367 = vector.load %arg3[%c39, %c0_263] : memref<56x56xf32, #tpu.memory_space<vmem>>, vector<1x50xf32>
    %c1_264 = arith.constant 1 : index
    %c0_265 = arith.constant 0 : index
    %c4_266 = arith.constant 4 : index
    %368 = vector.load %arg6[%c1_264, %c0_265, %c4_266] : memref<3x18x54xf32, #tpu.memory_space<vmem>>, vector<1x14x50xf32>
    %369 = vector.shape_cast %368 : vector<1x14x50xf32> to vector<14x50xf32>
    %370 = vector.broadcast %367 : vector<1x50xf32> to vector<14x50xf32>
    %371 = arith.mulf %370, %369 : vector<14x50xf32>
    %372 = arith.addf %366, %371 : vector<14x50xf32>
    %c40 = arith.constant 40 : index
    %c0_267 = arith.constant 0 : index
    %373 = vector.load %arg3[%c40, %c0_267] : memref<56x56xf32, #tpu.memory_space<vmem>>, vector<1x50xf32>
    %c1_268 = arith.constant 1 : index
    %c2_269 = arith.constant 2 : index
    %c0_270 = arith.constant 0 : index
    %374 = vector.load %arg6[%c1_268, %c2_269, %c0_270] : memref<3x18x54xf32, #tpu.memory_space<vmem>>, vector<1x14x50xf32>
    %375 = vector.shape_cast %374 : vector<1x14x50xf32> to vector<14x50xf32>
    %376 = vector.broadcast %373 : vector<1x50xf32> to vector<14x50xf32>
    %377 = arith.mulf %376, %375 : vector<14x50xf32>
    %378 = arith.addf %372, %377 : vector<14x50xf32>
    %c41_271 = arith.constant 41 : index
    %c0_272 = arith.constant 0 : index
    %379 = vector.load %arg3[%c41_271, %c0_272] : memref<56x56xf32, #tpu.memory_space<vmem>>, vector<1x50xf32>
    %c1_273 = arith.constant 1 : index
    %c2_274 = arith.constant 2 : index
    %c2_275 = arith.constant 2 : index
    %380 = vector.load %arg6[%c1_273, %c2_274, %c2_275] : memref<3x18x54xf32, #tpu.memory_space<vmem>>, vector<1x14x50xf32>
    %381 = vector.shape_cast %380 : vector<1x14x50xf32> to vector<14x50xf32>
    %382 = vector.broadcast %379 : vector<1x50xf32> to vector<14x50xf32>
    %383 = arith.mulf %382, %381 : vector<14x50xf32>
    %384 = arith.addf %378, %383 : vector<14x50xf32>
    %c42_276 = arith.constant 42 : index
    %c0_277 = arith.constant 0 : index
    %385 = vector.load %arg3[%c42_276, %c0_277] : memref<56x56xf32, #tpu.memory_space<vmem>>, vector<1x50xf32>
    %c1_278 = arith.constant 1 : index
    %c2_279 = arith.constant 2 : index
    %c4_280 = arith.constant 4 : index
    %386 = vector.load %arg6[%c1_278, %c2_279, %c4_280] : memref<3x18x54xf32, #tpu.memory_space<vmem>>, vector<1x14x50xf32>
    %387 = vector.shape_cast %386 : vector<1x14x50xf32> to vector<14x50xf32>
    %388 = vector.broadcast %385 : vector<1x50xf32> to vector<14x50xf32>
    %389 = arith.mulf %388, %387 : vector<14x50xf32>
    %390 = arith.addf %384, %389 : vector<14x50xf32>
    %c43 = arith.constant 43 : index
    %c0_281 = arith.constant 0 : index
    %391 = vector.load %arg3[%c43, %c0_281] : memref<56x56xf32, #tpu.memory_space<vmem>>, vector<1x50xf32>
    %c1_282 = arith.constant 1 : index
    %c4_283 = arith.constant 4 : index
    %c0_284 = arith.constant 0 : index
    %392 = vector.load %arg6[%c1_282, %c4_283, %c0_284] : memref<3x18x54xf32, #tpu.memory_space<vmem>>, vector<1x14x50xf32>
    %393 = vector.shape_cast %392 : vector<1x14x50xf32> to vector<14x50xf32>
    %394 = vector.broadcast %391 : vector<1x50xf32> to vector<14x50xf32>
    %395 = arith.mulf %394, %393 : vector<14x50xf32>
    %396 = arith.addf %390, %395 : vector<14x50xf32>
    %c44 = arith.constant 44 : index
    %c0_285 = arith.constant 0 : index
    %397 = vector.load %arg3[%c44, %c0_285] : memref<56x56xf32, #tpu.memory_space<vmem>>, vector<1x50xf32>
    %c1_286 = arith.constant 1 : index
    %c4_287 = arith.constant 4 : index
    %c2_288 = arith.constant 2 : index
    %398 = vector.load %arg6[%c1_286, %c4_287, %c2_288] : memref<3x18x54xf32, #tpu.memory_space<vmem>>, vector<1x14x50xf32>
    %399 = vector.shape_cast %398 : vector<1x14x50xf32> to vector<14x50xf32>
    %400 = vector.broadcast %397 : vector<1x50xf32> to vector<14x50xf32>
    %401 = arith.mulf %400, %399 : vector<14x50xf32>
    %402 = arith.addf %396, %401 : vector<14x50xf32>
    %c45 = arith.constant 45 : index
    %c0_289 = arith.constant 0 : index
    %403 = vector.load %arg3[%c45, %c0_289] : memref<56x56xf32, #tpu.memory_space<vmem>>, vector<1x50xf32>
    %c1_290 = arith.constant 1 : index
    %c4_291 = arith.constant 4 : index
    %c4_292 = arith.constant 4 : index
    %404 = vector.load %arg6[%c1_290, %c4_291, %c4_292] : memref<3x18x54xf32, #tpu.memory_space<vmem>>, vector<1x14x50xf32>
    %405 = vector.shape_cast %404 : vector<1x14x50xf32> to vector<14x50xf32>
    %406 = vector.broadcast %403 : vector<1x50xf32> to vector<14x50xf32>
    %407 = arith.mulf %406, %405 : vector<14x50xf32>
    %408 = arith.addf %402, %407 : vector<14x50xf32>
    %c46 = arith.constant 46 : index
    %c0_293 = arith.constant 0 : index
    %409 = vector.load %arg3[%c46, %c0_293] : memref<56x56xf32, #tpu.memory_space<vmem>>, vector<1x50xf32>
    %c2_294 = arith.constant 2 : index
    %c0_295 = arith.constant 0 : index
    %c0_296 = arith.constant 0 : index
    %410 = vector.load %arg6[%c2_294, %c0_295, %c0_296] : memref<3x18x54xf32, #tpu.memory_space<vmem>>, vector<1x14x50xf32>
    %411 = vector.shape_cast %410 : vector<1x14x50xf32> to vector<14x50xf32>
    %412 = vector.broadcast %409 : vector<1x50xf32> to vector<14x50xf32>
    %413 = arith.mulf %412, %411 : vector<14x50xf32>
    %c47 = arith.constant 47 : index
    %c0_297 = arith.constant 0 : index
    %414 = vector.load %arg3[%c47, %c0_297] : memref<56x56xf32, #tpu.memory_space<vmem>>, vector<1x50xf32>
    %c2_298 = arith.constant 2 : index
    %c0_299 = arith.constant 0 : index
    %c2_300 = arith.constant 2 : index
    %415 = vector.load %arg6[%c2_298, %c0_299, %c2_300] : memref<3x18x54xf32, #tpu.memory_space<vmem>>, vector<1x14x50xf32>
    %416 = vector.shape_cast %415 : vector<1x14x50xf32> to vector<14x50xf32>
    %417 = vector.broadcast %414 : vector<1x50xf32> to vector<14x50xf32>
    %418 = arith.mulf %417, %416 : vector<14x50xf32>
    %419 = arith.addf %413, %418 : vector<14x50xf32>
    %c48 = arith.constant 48 : index
    %c0_301 = arith.constant 0 : index
    %420 = vector.load %arg3[%c48, %c0_301] : memref<56x56xf32, #tpu.memory_space<vmem>>, vector<1x50xf32>
    %c2_302 = arith.constant 2 : index
    %c0_303 = arith.constant 0 : index
    %c4_304 = arith.constant 4 : index
    %421 = vector.load %arg6[%c2_302, %c0_303, %c4_304] : memref<3x18x54xf32, #tpu.memory_space<vmem>>, vector<1x14x50xf32>
    %422 = vector.shape_cast %421 : vector<1x14x50xf32> to vector<14x50xf32>
    %423 = vector.broadcast %420 : vector<1x50xf32> to vector<14x50xf32>
    %424 = arith.mulf %423, %422 : vector<14x50xf32>
    %425 = arith.addf %419, %424 : vector<14x50xf32>
    %c49 = arith.constant 49 : index
    %c0_305 = arith.constant 0 : index
    %426 = vector.load %arg3[%c49, %c0_305] : memref<56x56xf32, #tpu.memory_space<vmem>>, vector<1x50xf32>
    %c2_306 = arith.constant 2 : index
    %c2_307 = arith.constant 2 : index
    %c0_308 = arith.constant 0 : index
    %427 = vector.load %arg6[%c2_306, %c2_307, %c0_308] : memref<3x18x54xf32, #tpu.memory_space<vmem>>, vector<1x14x50xf32>
    %428 = vector.shape_cast %427 : vector<1x14x50xf32> to vector<14x50xf32>
    %429 = vector.broadcast %426 : vector<1x50xf32> to vector<14x50xf32>
    %430 = arith.mulf %429, %428 : vector<14x50xf32>
    %431 = arith.addf %425, %430 : vector<14x50xf32>
    %c50 = arith.constant 50 : index
    %c0_309 = arith.constant 0 : index
    %432 = vector.load %arg3[%c50, %c0_309] : memref<56x56xf32, #tpu.memory_space<vmem>>, vector<1x50xf32>
    %c2_310 = arith.constant 2 : index
    %c2_311 = arith.constant 2 : index
    %c2_312 = arith.constant 2 : index
    %433 = vector.load %arg6[%c2_310, %c2_311, %c2_312] : memref<3x18x54xf32, #tpu.memory_space<vmem>>, vector<1x14x50xf32>
    %434 = vector.shape_cast %433 : vector<1x14x50xf32> to vector<14x50xf32>
    %435 = vector.broadcast %432 : vector<1x50xf32> to vector<14x50xf32>
    %436 = arith.mulf %435, %434 : vector<14x50xf32>
    %437 = arith.addf %431, %436 : vector<14x50xf32>
    %c51 = arith.constant 51 : index
    %c0_313 = arith.constant 0 : index
    %438 = vector.load %arg3[%c51, %c0_313] : memref<56x56xf32, #tpu.memory_space<vmem>>, vector<1x50xf32>
    %c2_314 = arith.constant 2 : index
    %c2_315 = arith.constant 2 : index
    %c4_316 = arith.constant 4 : index
    %439 = vector.load %arg6[%c2_314, %c2_315, %c4_316] : memref<3x18x54xf32, #tpu.memory_space<vmem>>, vector<1x14x50xf32>
    %440 = vector.shape_cast %439 : vector<1x14x50xf32> to vector<14x50xf32>
    %441 = vector.broadcast %438 : vector<1x50xf32> to vector<14x50xf32>
    %442 = arith.mulf %441, %440 : vector<14x50xf32>
    %443 = arith.addf %437, %442 : vector<14x50xf32>
    %c52 = arith.constant 52 : index
    %c0_317 = arith.constant 0 : index
    %444 = vector.load %arg3[%c52, %c0_317] : memref<56x56xf32, #tpu.memory_space<vmem>>, vector<1x50xf32>
    %c2_318 = arith.constant 2 : index
    %c4_319 = arith.constant 4 : index
    %c0_320 = arith.constant 0 : index
    %445 = vector.load %arg6[%c2_318, %c4_319, %c0_320] : memref<3x18x54xf32, #tpu.memory_space<vmem>>, vector<1x14x50xf32>
    %446 = vector.shape_cast %445 : vector<1x14x50xf32> to vector<14x50xf32>
    %447 = vector.broadcast %444 : vector<1x50xf32> to vector<14x50xf32>
    %448 = arith.mulf %447, %446 : vector<14x50xf32>
    %449 = arith.addf %443, %448 : vector<14x50xf32>
    %c53 = arith.constant 53 : index
    %c0_321 = arith.constant 0 : index
    %450 = vector.load %arg3[%c53, %c0_321] : memref<56x56xf32, #tpu.memory_space<vmem>>, vector<1x50xf32>
    %c2_322 = arith.constant 2 : index
    %c4_323 = arith.constant 4 : index
    %c2_324 = arith.constant 2 : index
    %451 = vector.load %arg6[%c2_322, %c4_323, %c2_324] : memref<3x18x54xf32, #tpu.memory_space<vmem>>, vector<1x14x50xf32>
    %452 = vector.shape_cast %451 : vector<1x14x50xf32> to vector<14x50xf32>
    %453 = vector.broadcast %450 : vector<1x50xf32> to vector<14x50xf32>
    %454 = arith.mulf %453, %452 : vector<14x50xf32>
    %455 = arith.addf %449, %454 : vector<14x50xf32>
    %c54 = arith.constant 54 : index
    %c0_325 = arith.constant 0 : index
    %456 = vector.load %arg3[%c54, %c0_325] : memref<56x56xf32, #tpu.memory_space<vmem>>, vector<1x50xf32>
    %c2_326 = arith.constant 2 : index
    %c4_327 = arith.constant 4 : index
    %c4_328 = arith.constant 4 : index
    %457 = vector.load %arg6[%c2_326, %c4_327, %c4_328] : memref<3x18x54xf32, #tpu.memory_space<vmem>>, vector<1x14x50xf32>
    %458 = vector.shape_cast %457 : vector<1x14x50xf32> to vector<14x50xf32>
    %459 = vector.broadcast %456 : vector<1x50xf32> to vector<14x50xf32>
    %460 = arith.mulf %459, %458 : vector<14x50xf32>
    %461 = arith.addf %455, %460 : vector<14x50xf32>
    %462 = arith.addf %355, %408 : vector<14x50xf32>
    %c55 = arith.constant 55 : index
    %c0_329 = arith.constant 0 : index
    %463 = vector.load %arg3[%c55, %c0_329] : memref<56x56xf32, #tpu.memory_space<vmem>>, vector<1x50xf32>
    %464 = vector.broadcast %463 : vector<1x50xf32> to vector<14x50xf32>
    %465 = arith.addf %461, %464 : vector<14x50xf32>
    %466 = arith.addf %462, %465 : vector<14x50xf32>
    %467 = vector.extract_strided_slice %466 {offsets = [0, 0], sizes = [14, 14], strides = [1, 1]} : vector<14x50xf32> to vector<14x14xf32>
    %c0_330 = arith.constant 0 : index
    %c0_331 = arith.constant 0 : index
    %c0_332 = arith.constant 0 : index
    %c0_333 = arith.constant 0 : index
    %468 = vector.load %arg4[%c0_330, %c0_331, %c0_332, %c0_333] : memref<1x3x14x14xf32, #tpu.memory_space<vmem>>, vector<1x1x14x14xf32>
    %469 = vector.shape_cast %468 : vector<1x1x14x14xf32> to vector<14x14xf32>
    %470 = vector.shape_cast %467 : vector<14x14xf32> to vector<1x1x14x14xf32>
    tpu.vector_store %arg4[%c0_330, %c0_331, %c0_332, %c0_333], %470 {strides = array<i32>} : memref<1x3x14x14xf32, #tpu.memory_space<vmem>>, vector<1x1x14x14xf32>,
    %471 = vector.extract_strided_slice %466 {offsets = [0, 18], sizes = [14, 14], strides = [1, 1]} : vector<14x50xf32> to vector<14x14xf32>
    %c0_334 = arith.constant 0 : index
    %c1_335 = arith.constant 1 : index
    %c0_336 = arith.constant 0 : index
    %c0_337 = arith.constant 0 : index
    %472 = vector.load %arg4[%c0_334, %c1_335, %c0_336, %c0_337] : memref<1x3x14x14xf32, #tpu.memory_space<vmem>>, vector<1x1x14x14xf32>
    %473 = vector.shape_cast %472 : vector<1x1x14x14xf32> to vector<14x14xf32>
    %474 = vector.shape_cast %471 : vector<14x14xf32> to vector<1x1x14x14xf32>
    tpu.vector_store %arg4[%c0_334, %c1_335, %c0_336, %c0_337], %474 {strides = array<i32>} : memref<1x3x14x14xf32, #tpu.memory_space<vmem>>, vector<1x1x14x14xf32>,
    %475 = vector.extract_strided_slice %466 {offsets = [0, 36], sizes = [14, 14], strides = [1, 1]} : vector<14x50xf32> to vector<14x14xf32>
    %c0_338 = arith.constant 0 : index
    %c2_339 = arith.constant 2 : index
    %c0_340 = arith.constant 0 : index
    %c0_341 = arith.constant 0 : index
    %476 = vector.load %arg4[%c0_338, %c2_339, %c0_340, %c0_341] : memref<1x3x14x14xf32, #tpu.memory_space<vmem>>, vector<1x1x14x14xf32>
    %477 = vector.shape_cast %476 : vector<1x1x14x14xf32> to vector<14x14xf32>
    %478 = vector.shape_cast %475 : vector<14x14xf32> to vector<1x1x14x14xf32>
    tpu.vector_store %arg4[%c0_338, %c2_339, %c0_340, %c0_341], %478 {strides = array<i32>} : memref<1x3x14x14xf32, #tpu.memory_space<vmem>>, vector<1x1x14x14xf32>,
    return
  }
  func.func @transform_0(%arg0: i32) -> (i32, i32, i32, i32) {
    %c0_i32 = arith.constant 0 : i32
    %c0_i32_0 = arith.constant 0 : i32
    %c0_i32_1 = arith.constant 0 : i32
    %c0_i32_2 = arith.constant 0 : i32
    %c0_i32_3 = arith.constant 0 : i32
    return %c0_i32, %c0_i32_0, %c0_i32_1, %c0_i32_2 : i32, i32, i32, i32
  }
  func.func @transform_1(%arg0: i32) -> i32 {
    %c0_i32 = arith.constant 0 : i32
    %c0_i32_0 = arith.constant 0 : i32
    return %c0_i32 : i32
  }
  func.func @transform_2(%arg0: i32) -> (i32, i32) {
    %c0_i32 = arith.constant 0 : i32
    %c0_i32_0 = arith.constant 0 : i32
    %c0_i32_1 = arith.constant 0 : i32
    return %c0_i32, %c0_i32_0 : i32, i32
  }
  func.func @transform_3(%arg0: i32) -> (i32, i32, i32, i32) {
    %c0_i32 = arith.constant 0 : i32
    %c0_i32_0 = arith.constant 0 : i32
    %c0_i32_1 = arith.constant 0 : i32
    %c0_i32_2 = arith.constant 0 : i32
    %c0_i32_3 = arith.constant 0 : i32
    return %c0_i32, %c0_i32_0, %c0_i32_1, %c0_i32_2 : i32, i32, i32, i32
  }
}

</mosaic_0001>

<bundles_post_ra>
// kernel: tpu_custom_call.1
= control target key start
LH: loop header
LB: loop body
LE: loop exit
PB: predicated region body
PF: predicated region fallthrough
CT: control target
= control target key end

     0   :  { %8 = vsyncpa [#allocation5], 0  ;;  %s1673_s0 = inlined_call_operand.hbm [shape: f32[2,3,16,16], index: 0, kind: input, shape index: {}]   ;;  %s1674_s1 = inlined_call_operand.hbm [shape: f32[12], index: 1, kind: input, shape index: {}]   ;;  %s1675_s2 = inlined_call_operand.hbm [shape: f32[56,56], index: 2, kind: input, shape index: {}]   ;;  %s1676_s3 = inlined_call_operand.vmem [shape: f32[1,3,14,14], index: 3, kind: output, shape index: {}]  }
   0x1   :  { %9 = vsyncpa [#allocation6], 0  ;;  %s15_s14 = sshll.u32 %s1673_s0, 4  ;;  %s16_s14 = int_to_ptr.hbm [resolvable:$true] %s15_s14 }
   0x2   :  { %10 = vsyncpa [#allocation9], 0  ;;  %s1150_s15 = smov [#allocation4]   ;;  %s29_s19 = sshll.u32 %s1674_s1, 4  ;;  %s30_s19 = int_to_ptr.hbm [resolvable:$true] %s29_s19 }
   0x3   :  { %s17_s16 = sshll.u32 %s1150_s15, 4  ;;  %s1151_s20 = smov 128   ;;  %s18_s16 = int_to_ptr.vmem [resolvable:$true] %s17_s16 }
   0x4   :  { %s1152_s21 = smov 8   ;;  %s1153_s22 = smov [#allocation7]  }
   0x5   :  { %23 = dma.hbm_to_vmem [thread:$0]  %s16_s14, 768, %s18_s16, [#allocation5], %s1151_s20, %s1151_s20, %s1152_s21  }
   0x6   :  { %32 = dma.hbm_to_smem %s30_s19, 16, %s1153_s22, [#allocation6]  }
   0x7   :  { %s37_s25 = sshll.u32 %s1675_s2, 4  ;;  %s1154_s0 = smov [#allocation8]   ;;  %s38_s25 = int_to_ptr.hbm [resolvable:$true] %s37_s25 }
   0x8   :  { %s39_s26 = sshll.u32 %s1154_s0, 4  ;;  %s40_s26 = int_to_ptr.vmem [resolvable:$true] %s39_s26 }
   0x9   :  { %45 = dma.hbm_to_vmem [thread:$0]  %s38_s25, 896, %s40_s26, [#allocation9], %s1151_s20, %s1151_s20, %s1152_s21  }
   0xa   :  { %1144 = dma.done.wait [#allocation5], 768  }
   0xb   :  { %1145 = vsyncadd [#allocation5], 4294966528 }
   0xc   :  { %1146 = dma.done.wait [#allocation6], 16  }
   0xd   :  { %1147 = vsyncadd [#allocation6], 4294967280 }
   0xe   :  { %1148 = dma.done.wait [#allocation9], 896  }
   0xf   :  { %1149 = vsyncadd [#allocation9], 4294966400 }
  0x10   :  { %58 = sfence }
  0x11   :  { %s991_s1 = sld [smem:[#allocation7 + $0x9]]  ;;  %v1201_v0 = vld [vmem:[#allocation4] sm:$0xff]  ;;  %v1203_v1 = vld [vmem:[#allocation4 + $0x10] sm:$0xff]  ;;  %v1205_v2 = vld [vmem:[#allocation4 + $0x8] sm:$0xff]  ;;  %s1155_s7 = smov 2   ;;  %vm67_vm0 = vcmask 490496  }
  0x12   :  { %s91_s27 = sld [smem:[#allocation7]]  ;;  %v1207_v3 = vld [vmem:[#allocation4 + $0x20] sm:$0xff]  ;;  %v1211_v6 = vld [vmem:[#allocation4 + $0x18] sm:$0xff]  ;;  %v1220_v14 = vld [vmem:[#allocation4 + $0x28] sm:$0xff]  ;;  %s1156_s8 = smov 22   ;;  %vm70_vm1 = vcmask 486400  }
  0x13   :  { %s992_s28 = sld [smem:[#allocation7 + $0x1]]  ;;  %s1157_s9 = smov 42   ;;  %v1158_v36 = vmov 0.0   ;;  %vm109_vm2 = vcmask 154632   ;;  %vm112_vm3 = vcmask 148488   ;;  %vm122_vm4 = vcmask 146448  }
  0x14   :  { %s993_s29 = sld [smem:[#allocation7 + $0x2]]  ;;  %68 = vst.msk [vmem:[#allocation2] sm:$0xff] %vm67_vm0, %v1158_v36  ;;  %vm125_vm5 = vcmask 318632   ;;  %vm128_vm6 = vcmask 312488   ;;  %vm136_vm7 = vcmask 310448   ;;  %vm139_vm8 = vcmask 482632  }
  0x15   :  { %s995_s2 = sld [smem:[#allocation7 + $0x3]]  ;;  %69 = vst.msk [vmem:[#allocation2 + $0x8] sm:$0xff] %vm67_vm0, %v1158_v36  ;;  %vm142_vm9 = vcmask 476488   ;;  %vm150_vm10 = vcmask 474448   ;;  %s1159_s13 = smov 124   ;;  %vm78_vm11 = vcmask 441344  }
  0x16   :  { %s1215_s30 = sld [smem:[#allocation7 + $0x4]]  ;;  %71 = vst.msk [vmem:[#allocation2 + $0x10] sm:$0xf] %vm70_vm1, %v1158_v36  ;;  %s1160_s14 = smov 126   ;;  %vm81_vm12 = vcmask 435200   ;;  %vm581_vm13 = vcmask 138248  }
  0x17   :  { %v1209_v4 = vstv %s991_s1  ;;  %s994_s4 = sld [smem:[#allocation7 + $0xa]]  ;;  %72 = vst.msk [vmem:[#allocation2 + $0x18] sm:$0xff] %vm67_vm0, %v1158_v36  ;;  %s1161_s15 = smov 19   ;;  %vm590_vm14 = vcmask 285848   ;;  %vm599_vm15 = vcmask 433448  }
  0x18   :  { %v92_v5 = vstv %s91_s27  ;;  %s997_s5 = sld [smem:[#allocation7 + $0x5]]  ;;  %110 = vst.msk [vmem:[#allocation2 + $0x1] sm:$0xff] %vm109_vm2, %v1209_v4  ;;  %s1162_s16 = smov 1  }
  0x19   :  { %v93_v7 = vmul.f32 %v92_v5, %v1201_v0  ;;  %v98_v8 = vstv %s992_s28  ;;  %v94_v9 = vmul.f32 %v92_v5, %v1205_v2  ;;  %s1222_s6 = sld [smem:[#allocation7 + $0x6]]  ;;  %111 = vst.msk [vmem:[#allocation2 + $0x9] sm:$0xff] %vm109_vm2, %v1209_v4  ;;  %s1163_s17 = smov 37  }
  0x1a   :  { %v99_v10 = vmul.f32 %v98_v8, %v1203_v1  ;;  %v104_v11 = vstv %s993_s29  ;;  %v100_v17 = vmul.f32 %v98_v8, %v1211_v6  ;;  %s1243_s10 = sld [smem:[#allocation7 + $0x7]]  ;;  %73 = vst.msk [vmem:[#allocation2 + $0x20] sm:$0xff] %vm67_vm0, %v1158_v36  ;;  %s1164_s18 = smov 127  }
  0x1b   :  { %v95_v12 = vadd.f32 %v93_v7, %v1209_v4  ;;  %v105_v13 = vmul.f32 %v104_v11, %v1207_v3  ;;  %v96_v16 = vadd.f32 %v94_v9, %v1209_v4  ;;  %v156_v18 = vstv %s995_s2  ;;  %s998_s11 = sld [smem:[#allocation7 + $0xb]]  ;;  %74 = vst.msk [vmem:[#allocation2 + $0x28] sm:$0xf] %vm70_vm1, %v1158_v36  ;;  %s1165_s19 = smov 109  }
  0x1c   :  { %v106_v20 = vmul.f32 %v104_v11, %v1220_v14  ;;  %v157_v22 = vmul.f32 %v156_v18, %v1201_v0  ;;  %v162_v23 = vstv %s1215_s30  ;;  %v158_v24 = vmul.f32 %v156_v18, %v1205_v2  ;;  %s1250_s12 = sld [smem:[#allocation7 + $0x8]]  ;;  %75 = vst.msk [vmem:[#allocation2 + $0x30] sm:$0xff] %vm67_vm0, %v1158_v36  ;;  %s1166_s20 = smov 89  }
  0x1d   :  { %v101_v15 = vadd.f32 %v99_v10, %v95_v12  ;;  %v102_v21 = vadd.f32 %v100_v17, %v96_v16  ;;  %v1233_v25 = vstv %s994_s4  ;;  %v163_v26 = vmul.f32 %v162_v23, %v1203_v1  ;;  %76 = vst.msk [vmem:[#allocation2 + $0x38] sm:$0xff] %vm67_vm0, %v1158_v36  ;;  %s1167_s21 = smov 17   ;;  %s1168_s22 = smov 107  }
  0x1e   :  { %v168_v27 = vstv %s997_s5  ;;  %v159_v29 = vadd.f32 %v157_v22, %v1233_v25  ;;  %v160_v30 = vadd.f32 %v158_v24, %v1233_v25  ;;  %v164_v31 = vmul.f32 %v162_v23, %v1211_v6  ;;  %77 = vst.msk [vmem:[#allocation2 + $0x40] sm:$0xf] %vm70_vm1, %v1158_v36  ;;  %s1169_s23 = smov 125   ;;  %s1170_s24 = smov 92  }
  0x1f   :  { %v107_v19 = vadd.f32 %v105_v13, %v101_v15  ;;  %v108_v28 = vadd.f32 %v106_v20, %v102_v21  ;;  %v169_v32 = vmul.f32 %v168_v27, %v1207_v3  ;;  %v170_v35 = vmul.f32 %v168_v27, %v1220_v14  ;;  %174 = vst.msk [vmem:[#allocation2 + $0x19] sm:$0xff] %vm109_vm2, %v1233_v25  ;;  %s1171_s25 = smov 110  }
  0x20   :  { %v165_v33 = vadd.f32 %v163_v26, %v159_v29  ;;  %v166_v34 = vadd.f32 %v164_v31, %v160_v30  ;;  %v212_v39 = vstv %s1222_s6  ;;  %v218_v41 = vstv %s1243_s10  ;;  %175 = vst.msk [vmem:[#allocation2 + $0x21] sm:$0xff] %vm109_vm2, %v1233_v25  ;;  %v1028_v29 = vld [vmem:[#allocation8] ss:$0 sm:$0xff]  ;;  %v1040_v30 = vld [vmem:[#allocation8 + $0x1] ss:$0 sm:$0xff] }
  0x21   :  { %116 = vrot.lane.b32.xlu0 %v107_v19, %s1155_s7  ;;  %130 = vrot.lane.b32.xlu1 %v107_v19, %s1156_s8  ;;  %v213_v40 = vmul.f32 %v212_v39, %v1201_v0  ;;  %v214_v42 = vmul.f32 %v212_v39, %v1205_v2  ;;  %v1269_v43 = vstv %s998_s11  ;;  %v219_v44 = vmul.f32 %v218_v41, %v1203_v1 }
  0x22   :  { %144 = vrot.lane.b32.xlu2 %v107_v19, %s1157_s9  ;;  %v171_v37 = vadd.f32 %v169_v32, %v165_v33  ;;  %v172_v38 = vadd.f32 %v170_v35, %v166_v34  ;;  %v224_v46 = vstv %s1250_s12  ;;  %v220_v48 = vmul.f32 %v218_v41, %v1211_v6  ;;  %230 = vst.msk [vmem:[#allocation2 + $0x31] sm:$0xff] %vm109_vm2, %v1269_v43  ;;  %v1037_v32 = vld [vmem:[#allocation8 + $0x2] ss:$0 sm:$0xff]  ;;  %v1029_v35 = vld [vmem:[#allocation8 + $0x3] ss:$0 sm:$0xff] }
  0x23   :  { %v215_v45 = vadd.f32 %v213_v40, %v1269_v43  ;;  %v216_v47 = vadd.f32 %v214_v42, %v1269_v43  ;;  %v225_v49 = vmul.f32 %v224_v46, %v1207_v3  ;;  %v226_v52 = vmul.f32 %v224_v46, %v1220_v14  ;;  %231 = vst.msk [vmem:[#allocation2 + $0x39] sm:$0xff] %vm109_vm2, %v1269_v43 }
  0x24   :  { %113 = vst.msk [vmem:[#allocation2 + $0x11] sm:$0x3] %vm112_vm3, %v1209_v4  ;;  %vm960_vm0 = vcmask 113664   ;;  %vm962_vm1 = vcmask 111616  }
  0x25   :  { %v221_v50 = vadd.f32 %v219_v44, %v215_v45  ;;  %v222_v51 = vadd.f32 %v220_v48, %v216_v47  ;;  %176 = vst.msk [vmem:[#allocation2 + $0x29] sm:$0x3] %vm112_vm3, %v1233_v25  ;;  %v1038_v47 = vld [vmem:[#allocation8 + $0x4] ss:$0 sm:$0xff] }
  0x26   :  { %232 = vst.msk [vmem:[#allocation2 + $0x41] sm:$0x3] %vm112_vm3, %v1269_v43 }
  0x27   :  { %v227_v53 = vadd.f32 %v225_v49, %v221_v50  ;;  %v228_v54 = vadd.f32 %v226_v52, %v222_v51  ;;  %79 = vst.msk [vmem:[#allocation3] sm:$0xff] %vm78_vm11, %v1158_v36 }
  0x28   :  { %80 = vst.msk [vmem:[#allocation3 + $0x8] sm:$0xff] %vm78_vm11, %v1158_v36 }
  0x29   :  { %118 = vrot.lane.b32.xlu0 %v108_v28, %s1155_s7  ;;  %132 = vrot.lane.b32.xlu1 %v108_v28, %s1156_s8  ;;  %83 = vst.msk [vmem:[#allocation3 + $0x18] sm:$0xff] %vm78_vm11, %v1158_v36 }
  0x2a   :  { %146 = vrot.lane.b32.xlu2 %v108_v28, %s1157_s9  ;;  %84 = vst.msk [vmem:[#allocation3 + $0x20] sm:$0xff] %vm78_vm11, %v1158_v36 }
  0x2b   :  { %86 = vst.msk [vmem:[#allocation3 + $0x30] sm:$0xff] %vm78_vm11, %v1158_v36 }
  0x2c   :  { %87 = vst.msk [vmem:[#allocation3 + $0x38] sm:$0xff] %vm78_vm11, %v1158_v36 }
  0x2d   :  { %82 = vst.msk [vmem:[#allocation3 + $0x10] sm:$0x3] %vm81_vm12, %v1158_v36 }
  0x2e   :  { %85 = vst.msk [vmem:[#allocation3 + $0x28] sm:$0x3] %vm81_vm12, %v1158_v36 }
  0x2f   :  { %88 = vst.msk [vmem:[#allocation3 + $0x40] sm:$0x3] %vm81_vm12, %v1158_v36 }
  0x31   :  { %179 = vrot.lane.b32.xlu0 %v171_v37, %s1155_s7  ;;  %181 = vrot.lane.b32.xlu1 %v172_v38, %s1155_s7 }
  0x32   :  { %190 = vrot.lane.b32.xlu2 %v171_v37, %s1156_s8 }
  0x39   :  { %192 = vrot.lane.b32.xlu0 %v172_v38, %s1156_s8  ;;  %201 = vrot.lane.b32.xlu1 %v171_v37, %s1157_s9 }
  0x3a   :  { %203 = vrot.lane.b32.xlu2 %v172_v38, %s1157_s9 }
  0x41   :  { %235 = vrot.lane.b32.xlu0 %v227_v53, %s1155_s7  ;;  %237 = vrot.lane.b32.xlu1 %v228_v54, %s1155_s7 }
  0x42   :  { %246 = vrot.lane.b32.xlu2 %v227_v53, %s1156_s8 }
  0x49   :  { %248 = vrot.lane.b32.xlu0 %v228_v54, %s1156_s8  ;;  %257 = vrot.lane.b32.xlu1 %v227_v53, %s1157_s9 }
  0x4a   :  { %259 = vrot.lane.b32.xlu2 %v228_v54, %s1157_s9 }
  0x7c   :  { %v145_v55 = vpop.permute.xlu2 %144 }
  0x84   :  { %v147_v59 = vpop.permute.xlu2 %146 }
  0x8c   :  { %v191_v62 = vpop.permute.xlu2 %190 }
  0x93   :  { %v117_v56 = vpop.permute.xlu0 %116  ;;  %v131_v57 = vpop.permute.xlu1 %130 }
  0x94   :  { %123 = vst.msk [vmem:[#allocation2 + $0x2] sm:$0xff] %vm122_vm4, %v117_v56  ;;  %v204_v3 = vpop.permute.xlu2 %203 }
  0x95   :  { %126 = vst.msk [vmem:[#allocation2 + $0x1] sm:$0xff] %vm125_vm5, %v1209_v4 }
  0x9b   :  { %v119_v58 = vpop.permute.xlu0 %118  ;;  %v133_v60 = vpop.permute.xlu1 %132 }
  0x9c   :  { %124 = vst.msk [vmem:[#allocation2 + $0xa] sm:$0xff] %vm122_vm4, %v119_v58  ;;  %v247_v8 = vpop.permute.xlu2 %246  ;;  %v1043_v58 = vld [vmem:[#allocation8 + $0x5] ss:$0 sm:$0xff] }
  0x9d   :  { %127 = vst.msk [vmem:[#allocation2 + $0x9] sm:$0xff] %vm125_vm5, %v1209_v4 }
  0x9e   :  { %129 = vst.msk [vmem:[#allocation2 + $0x11] sm:$0x3] %vm128_vm6, %v1209_v4 }
  0x9f   :  { %138 = vst.msk [vmem:[#allocation2 + $0xa] sm:$0xff] %vm136_vm7, %v133_v60 }
  0xa0   :  { %137 = vst.msk [vmem:[#allocation2 + $0x2] sm:$0xff] %vm136_vm7, %v131_v57 }
  0xa1   :  { %140 = vst.msk [vmem:[#allocation2 + $0x1] sm:$0xff] %vm139_vm8, %v1209_v4 }
  0xa2   :  { %141 = vst.msk [vmem:[#allocation2 + $0x9] sm:$0xff] %vm139_vm8, %v1209_v4 }
  0xa3   :  { %143 = vst.msk [vmem:[#allocation2 + $0x11] sm:$0x3] %vm142_vm9, %v1209_v4  ;;  %v180_v61 = vpop.permute.xlu0 %179  ;;  %v182_v63 = vpop.permute.xlu1 %181 }
  0xa4   :  { %151 = vst.msk [vmem:[#allocation2 + $0x2] sm:$0xff] %vm150_vm10, %v145_v55  ;;  %v260_v12 = vpop.permute.xlu2 %259 }
  0xa5   :  { %152 = vst.msk [vmem:[#allocation2 + $0xa] sm:$0xff] %vm150_vm10, %v147_v59  ;;  %v1030_v59 = vld [vmem:[#allocation8 + $0x6] ss:$0 sm:$0xff] }
  0xa6   :  { %185 = vst.msk [vmem:[#allocation2 + $0x1a] sm:$0xff] %vm122_vm4, %v180_v61 }
  0xa7   :  { %187 = vst.msk [vmem:[#allocation2 + $0x19] sm:$0xff] %vm125_vm5, %v1233_v25 }
  0xa8   :  { %186 = vst.msk [vmem:[#allocation2 + $0x22] sm:$0xff] %vm122_vm4, %v182_v63 }
  0xa9   :  { %188 = vst.msk [vmem:[#allocation2 + $0x21] sm:$0xff] %vm125_vm5, %v1233_v25 }
  0xaa   :  { %189 = vst.msk [vmem:[#allocation2 + $0x29] sm:$0x3] %vm128_vm6, %v1233_v25 }
  0xab   :  { %v1332_v0 = vld [vmem:[#allocation2] sm:$0xff]  ;;  %196 = vst.msk [vmem:[#allocation2 + $0x1a] sm:$0xff] %vm136_vm7, %v191_v62  ;;  %v193_v1 = vpop.permute.xlu0 %192  ;;  %v202_v4 = vpop.permute.xlu1 %201 }
  0xac   :  { %v1335_v2 = vld [vmem:[#allocation2 + $0x8] sm:$0xff]  ;;  %287 = vrot.lane.b32.xlu2 %v1332_v0, %s1159_s13  ;;  %275 = vrot.lane.b32.xlu0 %v1332_v0, %s1160_s14  ;;  %198 = vst.msk [vmem:[#allocation2 + $0x19] sm:$0xff] %vm139_vm8, %v1233_v25  ;;  %v269_v34 = vmul.f32 %v1028_v29, %v1332_v0  ;;  %v1039_v62 = vld [vmem:[#allocation8 + $0x7] ss:$0 sm:$0xff] }
  0xad   :  { %277 = vrot.lane.b32.xlu1 %v1335_v2, %s1160_s14  ;;  %197 = vst.msk [vmem:[#allocation2 + $0x22] sm:$0xff] %vm136_vm7, %v193_v1  ;;  %v1352_v5 = vld [vmem:[#allocation2 + $0xa] sm:$0xff]  ;;  %v1354_v6 = vld [vmem:[#allocation2 + $0x2] sm:$0xff]  ;;  %v270_v39 = vmul.f32 %v1028_v29, %v1335_v2 }
  0xae   :  { %199 = vst.msk [vmem:[#allocation2 + $0x21] sm:$0xff] %vm139_vm8, %v1233_v25  ;;  %v1370_v10 = vld [vmem:[#allocation2 + $0x4] sm:$0xff]  ;;  %v1388_v14 = vld [vmem:[#allocation2 + $0xc] sm:$0xff]  ;;  %v301_v44 = vmul.f32 %v1029_v35, %v1354_v6  ;;  %v302_v53 = vmul.f32 %v1029_v35, %v1352_v5 }
  0xaf   :  { %200 = vst.msk [vmem:[#allocation2 + $0x29] sm:$0x3] %vm142_vm9, %v1233_v25  ;;  %v1031_v35 = vld [vmem:[#allocation8 + $0x9] ss:$0 sm:$0xff] }
  0xb0   :  { %208 = vst.msk [vmem:[#allocation2 + $0x22] sm:$0xff] %vm150_vm10, %v204_v3  ;;  %v335_v3 = vmul.f32 %v1030_v59, %v1370_v10 }
  0xb1   :  { %207 = vst.msk [vmem:[#allocation2 + $0x1a] sm:$0xff] %vm150_vm10, %v202_v4 }
  0xb3   :  { %v236_v7 = vpop.permute.xlu0 %235  ;;  %v238_v9 = vpop.permute.xlu1 %237 }
  0xb4   :  { %311 = vrot.lane.b32.xlu2 %v1352_v5, %s1160_s14  ;;  %289 = vrot.lane.b32.xlu0 %v1335_v2, %s1159_s13  ;;  %241 = vst.msk [vmem:[#allocation2 + $0x32] sm:$0xff] %vm122_vm4, %v236_v7 }
  0xb5   :  { %309 = vrot.lane.b32.xlu1 %v1354_v6, %s1160_s14  ;;  %243 = vst.msk [vmem:[#allocation2 + $0x31] sm:$0xff] %vm125_vm5, %v1269_v43 }
  0xb6   :  { %242 = vst.msk [vmem:[#allocation2 + $0x3a] sm:$0xff] %vm122_vm4, %v238_v9 }
  0xb7   :  { %244 = vst.msk [vmem:[#allocation2 + $0x39] sm:$0xff] %vm125_vm5, %v1269_v43  ;;  %v1406_v17 = vld [vmem:[#allocation2 + $0x22] sm:$0xff] }
  0xb8   :  { %245 = vst.msk [vmem:[#allocation2 + $0x41] sm:$0x3] %vm128_vm6, %v1269_v43  ;;  %v1396_v15 = vld [vmem:[#allocation2 + $0x18] sm:$0xff]  ;;  %v1398_v16 = vld [vmem:[#allocation2 + $0x20] sm:$0xff] }
  0xb9   :  { %252 = vst.msk [vmem:[#allocation2 + $0x32] sm:$0xff] %vm136_vm7, %v247_v8  ;;  %v1408_v18 = vld [vmem:[#allocation2 + $0x1a] sm:$0xff]  ;;  %v1424_v20 = vld [vmem:[#allocation2 + $0x24] sm:$0xff] }
  0xba   :  { %254 = vst.msk [vmem:[#allocation2 + $0x31] sm:$0xff] %vm139_vm8, %v1269_v43  ;;  %v1416_v19 = vld [vmem:[#allocation2 + $0x1c] sm:$0xff] }
  0xbb   :  { %v249_v11 = vpop.permute.xlu0 %248  ;;  %v258_v13 = vpop.permute.xlu1 %257 }
  0xbc   :  { %343 = vrot.lane.b32.xlu2 %v1370_v10, %s1160_s14  ;;  %321 = vrot.lane.b32.xlu0 %v1354_v6, %s1159_s13  ;;  %253 = vst.msk [vmem:[#allocation2 + $0x3a] sm:$0xff] %vm136_vm7, %v249_v11  ;;  %v336_v6 = vmul.f32 %v1030_v59, %v1388_v14  ;;  %v1041_v11 = vld [vmem:[#allocation8 + $0x8] ss:$0 sm:$0xff]  ;;  %v1033_v59 = vld [vmem:[#allocation8 + $0xf] ss:$0 sm:$0xff] }
  0xbd   :  { %323 = vrot.lane.b32.xlu1 %v1352_v5, %s1159_s13  ;;  %255 = vst.msk [vmem:[#allocation2 + $0x39] sm:$0xff] %vm139_vm8, %v1269_v43 }
  0xbe   :  { %256 = vst.msk [vmem:[#allocation2 + $0x41] sm:$0x3] %vm142_vm9, %v1269_v43 }
  0xbf   :  { %264 = vst.msk [vmem:[#allocation2 + $0x3a] sm:$0xff] %vm150_vm10, %v260_v12 }
  0xc0   :  { %263 = vst.msk [vmem:[#allocation2 + $0x32] sm:$0xff] %vm150_vm10, %v258_v13 }
  0xc4   :  { %357 = vrot.lane.b32.xlu2 %v1388_v14, %s1159_s13  ;;  %345 = vrot.lane.b32.xlu0 %v1388_v14, %s1160_s14  ;;  %v369_v14 = vmul.f32 %v1031_v35, %v1396_v15 }
  0xc5   :  { %355 = vrot.lane.b32.xlu1 %v1370_v10, %s1159_s13  ;;  %v1046_v10 = vld [vmem:[#allocation8 + $0xa] ss:$0 sm:$0xff] }
  0xc6   :  { %v1442_v23 = vld [vmem:[#allocation2 + $0x3a] sm:$0xff] }
  0xc7   :  { %v1432_v21 = vld [vmem:[#allocation2 + $0x30] sm:$0xff]  ;;  %v1434_v22 = vld [vmem:[#allocation2 + $0x38] sm:$0xff] }
  0xc8   :  { %v1444_v24 = vld [vmem:[#allocation2 + $0x32] sm:$0xff]  ;;  %v1460_v26 = vld [vmem:[#allocation2 + $0x3c] sm:$0xff] }
  0xc9   :  { %v1452_v25 = vld [vmem:[#allocation2 + $0x34] sm:$0xff] }
  0xcc   :  { %387 = vrot.lane.b32.xlu2 %v1396_v15, %s1159_s13  ;;  %375 = vrot.lane.b32.xlu0 %v1396_v15, %s1160_s14  ;;  %v1044_v15 = vld [vmem:[#allocation8 + $0xd] ss:$0 sm:$0xff] }
  0xcd   :  { %377 = vrot.lane.b32.xlu1 %v1398_v16, %s1160_s14 }
  0xd4   :  { %411 = vrot.lane.b32.xlu2 %v1406_v17, %s1160_s14  ;;  %389 = vrot.lane.b32.xlu0 %v1398_v16, %s1159_s13 }
  0xd5   :  { %409 = vrot.lane.b32.xlu1 %v1408_v18, %s1160_s14 }
  0xdc   :  { %443 = vrot.lane.b32.xlu2 %v1416_v19, %s1160_s14  ;;  %421 = vrot.lane.b32.xlu0 %v1408_v18, %s1159_s13 }
  0xdd   :  { %423 = vrot.lane.b32.xlu1 %v1406_v17, %s1159_s13 }
  0xe4   :  { %457 = vrot.lane.b32.xlu2 %v1424_v20, %s1159_s13  ;;  %445 = vrot.lane.b32.xlu0 %v1424_v20, %s1160_s14 }
  0xe5   :  { %455 = vrot.lane.b32.xlu1 %v1416_v19, %s1159_s13 }
  0xec   :  { %487 = vrot.lane.b32.xlu2 %v1432_v21, %s1159_s13  ;;  %475 = vrot.lane.b32.xlu0 %v1432_v21, %s1160_s14 }
  0xed   :  { %477 = vrot.lane.b32.xlu1 %v1434_v22, %s1160_s14 }
  0xf4   :  { %511 = vrot.lane.b32.xlu2 %v1442_v23, %s1160_s14  ;;  %489 = vrot.lane.b32.xlu0 %v1434_v22, %s1159_s13 }
  0xf5   :  { %509 = vrot.lane.b32.xlu1 %v1444_v24, %s1160_s14 }
  0xfc   :  { %543 = vrot.lane.b32.xlu2 %v1452_v25, %s1160_s14  ;;  %521 = vrot.lane.b32.xlu0 %v1444_v24, %s1159_s13 }
  0xfd   :  { %523 = vrot.lane.b32.xlu1 %v1442_v23, %s1159_s13 }
 0x104   :  { %557 = vrot.lane.b32.xlu2 %v1460_v26, %s1159_s13  ;;  %545 = vrot.lane.b32.xlu0 %v1460_v26, %s1160_s14 }
 0x105   :  { %555 = vrot.lane.b32.xlu1 %v1452_v25, %s1159_s13 }
 0x106   :  { %v288_v27 = vpop.permute.xlu2 %287 }
 0x107   :  { %v293_v41 = vmul.f32 %v1037_v32, %v288_v27 }
 0x10e   :  { %v312_v28 = vpop.permute.xlu2 %311 }
 0x10f   :  { %v316_v56 = vmul.f32 %v1038_v47, %v312_v28 }
 0x116   :  { %v344_v31 = vpop.permute.xlu2 %343 }
 0x117   :  { %v349_v5 = vmul.f32 %v1039_v62, %v344_v31  ;;  %v1032_v31 = vld [vmem:[#allocation8 + $0xc] ss:$0 sm:$0xff] }
 0x11e   :  { %v276_v33 = vpop.permute.xlu0 %275  ;;  %v358_v48 = vpop.permute.xlu2 %357 }
 0x11f   :  { %v278_v37 = vpop.permute.xlu1 %277  ;;  %v281_v38 = vmul.f32 %v1040_v30, %v276_v33 }
 0x120   :  { %v282_v40 = vmul.f32 %v1040_v30, %v278_v37  ;;  %v362_v30 = vmul.f32 %v1041_v11, %v358_v48  ;;  %v370_v48 = vmul.f32 %v1031_v35, %v1398_v16  ;;  %v1034_v35 = vld [vmem:[#allocation8 + $0x12] ss:$0 sm:$0xff] }
 0x121   :  { %v283_v42 = vadd.f32 %v281_v38, %v269_v34  ;;  %v1042_v38 = vld [vmem:[#allocation8 + $0xb] ss:$0 sm:$0xff] }
 0x122   :  { %v284_v43 = vadd.f32 %v282_v40, %v270_v39 }
 0x123   :  { %v295_v45 = vadd.f32 %v293_v41, %v283_v42 }
 0x125   :  { %v303_v46 = vadd.f32 %v301_v44, %v295_v45  ;;  %v401_v44 = vmul.f32 %v1032_v31, %v1408_v18 }
 0x126   :  { %v290_v49 = vpop.permute.xlu0 %289  ;;  %v388_v1 = vpop.permute.xlu2 %387 }
 0x127   :  { %v310_v50 = vpop.permute.xlu1 %309  ;;  %v294_v51 = vmul.f32 %v1037_v32, %v290_v49  ;;  %v393_v42 = vmul.f32 %v1042_v38, %v388_v1 }
 0x128   :  { %v315_v52 = vmul.f32 %v1038_v47, %v310_v50 }
 0x129   :  { %v296_v54 = vadd.f32 %v294_v51, %v284_v43 }
 0x12a   :  { %v317_v55 = vadd.f32 %v315_v52, %v303_v46 }
 0x12b   :  { %v304_v57 = vadd.f32 %v302_v53, %v296_v54  ;;  %v402_v54 = vmul.f32 %v1032_v31, %v1406_v17  ;;  %v1045_v17 = vld [vmem:[#allocation8 + $0x10] ss:$0 sm:$0xff]  ;;  %v469_v31 = vmul.f32 %v1034_v35, %v1432_v21  ;;  %v1050_v21 = vld [vmem:[#allocation8 + $0x16] ss:$0 sm:$0xff] }
 0x12d   :  { %v318_v60 = vadd.f32 %v316_v56, %v304_v57 }
 0x12e   :  { %v322_v61 = vpop.permute.xlu0 %321  ;;  %v412_v33 = vpop.permute.xlu2 %411 }
 0x12f   :  { %v324_v63 = vpop.permute.xlu1 %323  ;;  %v327_v0 = vmul.f32 %v1043_v58, %v322_v61 }
 0x130   :  { %v328_v2 = vmul.f32 %v1043_v58, %v324_v63  ;;  %v1049_v58 = vld [vmem:[#allocation8 + $0xe] ss:$0 sm:$0xff] }
 0x131   :  { %v329_v4 = vadd.f32 %v327_v0, %v317_v55 }
 0x132   :  { %v330_v7 = vadd.f32 %v328_v2, %v318_v60  ;;  %v416_v60 = vmul.f32 %v1044_v15, %v412_v33  ;;  %v435_v2 = vmul.f32 %v1033_v59, %v1416_v19 }
 0x133   :  { %v337_v8 = vadd.f32 %v335_v3, %v329_v4  ;;  %v436_v4 = vmul.f32 %v1033_v59, %v1424_v20  ;;  %v1048_v20 = vld [vmem:[#allocation8 + $0x14] ss:$0 sm:$0xff] }
 0x134   :  { %v338_v9 = vadd.f32 %v336_v6, %v330_v7 }
 0x135   :  { %v351_v12 = vadd.f32 %v349_v5, %v337_v8  ;;  %v1047_v8 = vld [vmem:[#allocation8 + $0x11] ss:$0 sm:$0xff] }
 0x136   :  { %v346_v13 = vpop.permute.xlu0 %345  ;;  %v444_v47 = vpop.permute.xlu2 %443 }
 0x137   :  { %v356_v27 = vpop.permute.xlu1 %355  ;;  %v350_v28 = vmul.f32 %v1039_v62, %v346_v13 }
 0x138   :  { %v361_v29 = vmul.f32 %v1041_v11, %v356_v27 }
 0x139   :  { %v352_v32 = vadd.f32 %v350_v28, %v338_v9  ;;  %v449_v9 = vmul.f32 %v1045_v17, %v444_v47 }
 0x13a   :  { %v363_v34 = vadd.f32 %v361_v29, %v351_v12 }
 0x13b   :  { %v364_v37 = vadd.f32 %v362_v30, %v352_v32 }
 0x13e   :  { %v376_v39 = vpop.permute.xlu0 %375  ;;  %v458_v18 = vpop.permute.xlu2 %457 }
 0x13f   :  { %v378_v40 = vpop.permute.xlu1 %377  ;;  %v381_v41 = vmul.f32 %v1046_v10, %v376_v39  ;;  %v462_v30 = vmul.f32 %v1047_v8, %v458_v18 }
 0x140   :  { %v382_v45 = vmul.f32 %v1046_v10, %v378_v40  ;;  %v1052_v10 = vld [vmem:[#allocation8 + $0x13] ss:$0 sm:$0xff]  ;;  %v1035_v40 = vld [vmem:[#allocation8 + $0x15] ss:$0 sm:$0xff] }
 0x141   :  { %v383_v43 = vadd.f32 %v381_v41, %v369_v14 }
 0x142   :  { %v384_v51 = vadd.f32 %v382_v45, %v370_v48 }
 0x143   :  { %v395_v46 = vadd.f32 %v393_v42, %v383_v43 }
 0x145   :  { %v403_v49 = vadd.f32 %v401_v44, %v395_v46  ;;  %v501_v46 = vmul.f32 %v1035_v40, %v1444_v24 }
 0x146   :  { %v390_v50 = vpop.permute.xlu0 %389  ;;  %v488_v27 = vpop.permute.xlu2 %487 }
 0x147   :  { %v410_v52 = vpop.permute.xlu1 %409  ;;  %v394_v53 = vmul.f32 %v1042_v38, %v390_v50  ;;  %v493_v43 = vmul.f32 %v1048_v20, %v488_v27 }
 0x148   :  { %v415_v56 = vmul.f32 %v1044_v15, %v410_v52 }
 0x149   :  { %v396_v55 = vadd.f32 %v394_v53, %v384_v51  ;;  %v502_v53 = vmul.f32 %v1035_v40, %v1442_v23  ;;  %v1051_v23 = vld [vmem:[#allocation8 + $0x19] ss:$0 sm:$0xff] }
 0x14a   :  { %v417_v62 = vadd.f32 %v415_v56, %v403_v49  ;;  %v470_v49 = vmul.f32 %v1034_v35, %v1434_v22  ;;  %v1054_v56 = vld [vmem:[#allocation8 + $0x17] ss:$0 sm:$0xff] }
 0x14b   :  { %v404_v57 = vadd.f32 %v402_v54, %v396_v55 }
 0x14d   :  { %v418_v16 = vadd.f32 %v416_v60, %v404_v57 }
 0x14e   :  { %v422_v61 = vpop.permute.xlu0 %421  ;;  %v512_v45 = vpop.permute.xlu2 %511 }
 0x14f   :  { %v424_v63 = vpop.permute.xlu1 %423  ;;  %v427_v0 = vmul.f32 %v1049_v58, %v422_v61  ;;  %v516_v59 = vmul.f32 %v1050_v21, %v512_v45 }
 0x150   :  { %v428_v1 = vmul.f32 %v1049_v58, %v424_v63  ;;  %v1036_v58 = vld [vmem:[#allocation8 + $0x18] ss:$0 sm:$0xff] }
 0x151   :  { %v429_v3 = vadd.f32 %v427_v0, %v417_v62  ;;  %v535_v63 = vmul.f32 %v1036_v58, %v1452_v25 }
 0x152   :  { %v430_v6 = vadd.f32 %v428_v1, %v418_v16  ;;  %v536_v16 = vmul.f32 %v1036_v58, %v1460_v26 }
 0x153   :  { %v437_v7 = vadd.f32 %v435_v2, %v429_v3 }
 0x154   :  { %v438_v5 = vadd.f32 %v436_v4, %v430_v6  ;;  %v1053_v4 = vld [vmem:[#allocation8 + $0x1a] ss:$0 sm:$0xff] }
 0x155   :  { %v451_v28 = vadd.f32 %v449_v9, %v437_v7  ;;  %v1055_v9 = vld [vmem:[#allocation8 + $0x1b] ss:$0 sm:$0xff] }
 0x156   :  { %v446_v11 = vpop.permute.xlu0 %445  ;;  %v544_v57 = vpop.permute.xlu2 %543 }
 0x157   :  { %v456_v12 = vpop.permute.xlu1 %455  ;;  %v450_v13 = vmul.f32 %v1045_v17, %v446_v11  ;;  %v549_v17 = vmul.f32 %v1051_v23, %v544_v57 }
 0x158   :  { %v461_v29 = vmul.f32 %v1047_v8, %v456_v12 }
 0x159   :  { %v452_v32 = vadd.f32 %v450_v13, %v438_v5 }
 0x15a   :  { %v463_v33 = vadd.f32 %v461_v29, %v451_v28 }
 0x15b   :  { %v464_v19 = vadd.f32 %v462_v30, %v452_v32 }
 0x15c   :  { %v565_v38 = vadd.f32 %v463_v33, %v363_v34 }
 0x15d   :  { %v566_v39 = vadd.f32 %v464_v19, %v364_v37 }
 0x15e   :  { %v476_v14 = vpop.permute.xlu0 %475  ;;  %v558_v6 = vpop.permute.xlu2 %557 }
 0x15f   :  { %v478_v41 = vpop.permute.xlu1 %477  ;;  %v481_v42 = vmul.f32 %v1052_v10, %v476_v14  ;;  %v562_v13 = vmul.f32 %v1053_v4, %v558_v6 }
 0x160   :  { %v482_v47 = vmul.f32 %v1052_v10, %v478_v41 }
 0x161   :  { %v483_v44 = vadd.f32 %v481_v42, %v469_v31 }
 0x162   :  { %v484_v34 = vadd.f32 %v482_v47, %v470_v49 }
 0x163   :  { %v495_v48 = vadd.f32 %v493_v43, %v483_v44 }
 0x165   :  { %v503_v50 = vadd.f32 %v501_v46, %v495_v48 }
 0x166   :  { %v490_v51 = vpop.permute.xlu0 %489 }
 0x167   :  { %v510_v52 = vpop.permute.xlu1 %509  ;;  %v494_v37 = vmul.f32 %v1048_v20, %v490_v51 }
 0x168   :  { %v515_v15 = vmul.f32 %v1050_v21, %v510_v52 }
 0x169   :  { %v496_v54 = vadd.f32 %v494_v37, %v484_v34 }
 0x16a   :  { %v517_v60 = vadd.f32 %v515_v15, %v503_v50 }
 0x16b   :  { %v504_v55 = vadd.f32 %v502_v53, %v496_v54 }
 0x16d   :  { %v518_v22 = vadd.f32 %v516_v59, %v504_v55 }
 0x16e   :  { %v522_v24 = vpop.permute.xlu0 %521 }
 0x16f   :  { %v524_v18 = vpop.permute.xlu1 %523  ;;  %v527_v61 = vmul.f32 %v1054_v56, %v522_v24 }
 0x170   :  { %v528_v62 = vmul.f32 %v1054_v56, %v524_v18 }
 0x171   :  { %v529_v0 = vadd.f32 %v527_v61, %v517_v60  ;;  %v1056_v61 = vld [vmem:[#allocation8 + $0x1c] ss:$0 sm:$0xff] }
 0x172   :  { %v530_v1 = vadd.f32 %v528_v62, %v518_v22  ;;  %v1067_v22 = vld [vmem:[#allocation8 + $0x1d] ss:$0 sm:$0xff] }
 0x173   :  { %v537_v2 = vadd.f32 %v535_v63, %v529_v0  ;;  %v1065_v63 = vld [vmem:[#allocation8 + $0x1e] ss:$0 sm:$0xff] }
 0x174   :  { %v538_v3 = vadd.f32 %v536_v16, %v530_v1 }
 0x175   :  { %v551_v11 = vadd.f32 %v549_v17, %v537_v2 }
 0x176   :  { %v546_v7 = vpop.permute.xlu0 %545 }
 0x177   :  { %v556_v5 = vpop.permute.xlu1 %555  ;;  %v550_v8 = vmul.f32 %v1051_v23, %v546_v7  ;;  %v1057_v23 = vld [vmem:[#allocation8 + $0x1f] ss:$0 sm:$0xff] }
 0x178   :  { %v561_v12 = vmul.f32 %v1053_v4, %v556_v5 }
 0x179   :  { %v552_v27 = vadd.f32 %v550_v8, %v538_v3 }
 0x17a   :  { %v563_v28 = vadd.f32 %v561_v12, %v551_v11  ;;  %v1066_v12 = vld [vmem:[#allocation8 + $0x20] ss:$0 sm:$0xff] }
 0x17b   :  { %v564_v25 = vadd.f32 %v562_v13, %v552_v27 }
 0x17c   :  { %v569_v29 = vadd.f32 %v1055_v9, %v563_v28 }
 0x17d   :  { %v570_v30 = vadd.f32 %v1055_v9, %v564_v25 }
 0x17e   :  { %v571_v26 = vadd.f32 %v569_v29, %v565_v38 }
 0x17f   :  { %v572_v32 = vadd.f32 %v570_v30, %v566_v39 }
 0x180   :  { %584 = vrot.lane.b32.xlu2 %v571_v26, %s1161_s15  ;;  %575 = vrot.lane.b32.xlu0 %v571_v26, %s1162_s16 }
 0x181   :  { %577 = vrot.lane.b32.xlu1 %v572_v32, %s1162_s16 }
 0x188   :  { %595 = vrot.lane.b32.xlu2 %v572_v32, %s1163_s17  ;;  %586 = vrot.lane.b32.xlu0 %v572_v32, %s1161_s15 }
 0x189   :  { %593 = vrot.lane.b32.xlu1 %v571_v26, %s1163_s17 }
 0x190   :  { %611 = vrot.lane.b32.xlu2 %v571_v26, %s1164_s18  ;;  %602 = vrot.lane.b32.xlu0 %v571_v26, %s1165_s19 }
 0x191   :  { %604 = vrot.lane.b32.xlu1 %v572_v32, %s1165_s19 }
 0x198   :  { %613 = vrot.lane.b32.xlu2 %v572_v32, %s1164_s18  ;;  %627 = vrot.lane.b32.xlu0 %v571_v26, %s1166_s20 }
 0x199   :  { %629 = vrot.lane.b32.xlu1 %v572_v32, %s1166_s20 }
 0x1a0   :  { %619 = vrot.lane.b32.xlu2 %v571_v26, %s1167_s21  ;;  %636 = vrot.lane.b32.xlu0 %v571_v26, %s1168_s22 }
 0x1a1   :  { %638 = vrot.lane.b32.xlu1 %v572_v32, %s1168_s22 }
 0x1a8   :  { %646 = vrot.lane.b32.xlu2 %v572_v32, %s1169_s23  ;;  %621 = vrot.lane.b32.xlu0 %v572_v32, %s1167_s21 }
 0x1a9   :  { %644 = vrot.lane.b32.xlu1 %v571_v26, %s1169_s23 }
 0x1da   :  { %v585_v33 = vpop.permute.xlu2 %584 }
 0x1e2   :  { %v596_v35 = vpop.permute.xlu2 %595 }
 0x1ea   :  { %v612_v19 = vpop.permute.xlu2 %611 }
 0x1f2   :  { %v576_v10 = vpop.permute.xlu0 %575  ;;  %v614_v20 = vpop.permute.xlu2 %613 }
 0x1f3   :  { %582 = vst.msk [vmem:[#allocation3 + $0x1] sm:$0xff] %vm581_vm13, %v576_v10  ;;  %v578_v38 = vpop.permute.xlu1 %577 }
 0x1f4   :  { %583 = vst.msk [vmem:[#allocation3 + $0x9] sm:$0xff] %vm581_vm13, %v578_v38 }
 0x1f5   :  { %591 = vst.msk [vmem:[#allocation3 + $0x1] sm:$0xff] %vm590_vm14, %v585_v33 }
 0x1fa   :  { %v587_v39 = vpop.permute.xlu0 %586  ;;  %v620_v40 = vpop.permute.xlu2 %619 }
 0x1fb   :  { %592 = vst.msk [vmem:[#allocation3 + $0x9] sm:$0xff] %vm590_vm14, %v587_v39  ;;  %v594_v14 = vpop.permute.xlu1 %593  ;;  %v1069_v39 = vld [vmem:[#allocation8 + $0x27] ss:$0 sm:$0xff] }
 0x1fc   :  { %601 = vst.msk [vmem:[#allocation3 + $0x9] sm:$0xff] %vm599_vm15, %v596_v35  ;;  %v1625_v35 = vld [vmem:[#allocation8 + $0x21] ss:$0 sm:$0xff] }
 0x1fd   :  { %600 = vst.msk [vmem:[#allocation3 + $0x1] sm:$0xff] %vm599_vm15, %v594_v14 }
 0x202   :  { %v603_v36 = vpop.permute.xlu0 %602  ;;  %v647_v49 = vpop.permute.xlu2 %646 }
 0x203   :  { %609 = vst.msk [vmem:[#allocation3 + $0x19] sm:$0xff] %vm581_vm13, %v603_v36  ;;  %v605_v31 = vpop.permute.xlu1 %604  ;;  %v1518_v45 = vld [vmem:[#allocation3 + $0xa] sm:$0x3f] }
 0x204   :  { %617 = vst.msk [vmem:[#allocation3 + $0x19] sm:$0xff] %vm590_vm14, %v612_v19  ;;  %v1503_v41 = vld [vmem:[#allocation3] sm:$0xff]  ;;  %v1505_v42 = vld [vmem:[#allocation3 + $0x8] sm:$0x3f]  ;;  %v689_v29 = vmul.f32 %v1057_v23, %v1518_v45  ;;  %v1058_v19 = vld [vmem:[#allocation8 + $0x25] ss:$0 sm:$0xff] }
 0x205   :  { %625 = vst.msk [vmem:[#allocation3 + $0x19] sm:$0xff] %vm599_vm15, %v620_v40  ;;  %674 = vrot.lane.b32.xlu2 %v1503_v41, %s1159_s13  ;;  %662 = vrot.lane.b32.xlu0 %v1503_v41, %s1160_s14  ;;  %v1524_v46 = vld [vmem:[#allocation3 + $0x2] sm:$0xff]  ;;  %v1585_v56 = vld [vmem:[#allocation3 + $0xc] sm:$0x3f]  ;;  %v656_v16 = vmul.f32 %v1056_v61, %v1503_v41  ;;  %v657_v3 = vmul.f32 %v1056_v61, %v1505_v42  ;;  %v1060_v41 = vld [vmem:[#allocation8 + $0x28] ss:$0 sm:$0xff] }
 0x206   :  { %610 = vst.msk [vmem:[#allocation3 + $0x21] sm:$0xff] %vm581_vm13, %v605_v31  ;;  %664 = vrot.lane.b32.xlu1 %v1505_v42, %s1160_s14  ;;  %v1587_v57 = vld [vmem:[#allocation3 + $0x4] sm:$0xff]  ;;  %v688_v5 = vmul.f32 %v1057_v23, %v1524_v46 }
 0x207   :  { %618 = vst.msk [vmem:[#allocation3 + $0x21] sm:$0xff] %vm590_vm14, %v614_v20  ;;  %v1068_v20 = vld [vmem:[#allocation8 + $0x26] ss:$0 sm:$0xff] }
 0x20a   :  { %v628_v43 = vpop.permute.xlu0 %627 }
 0x20b   :  { %634 = vst.msk [vmem:[#allocation3 + $0x31] sm:$0xff] %vm581_vm13, %v628_v43  ;;  %v630_v44 = vpop.permute.xlu1 %629 }
 0x20c   :  { %635 = vst.msk [vmem:[#allocation3 + $0x39] sm:$0xff] %vm581_vm13, %v630_v44  ;;  %v1533_v50 = vld [vmem:[#allocation3 + $0x18] sm:$0xff] }
 0x20d   :  { %698 = vrot.lane.b32.xlu2 %v1518_v45, %s1160_s14  ;;  %676 = vrot.lane.b32.xlu0 %v1505_v42, %s1159_s13  ;;  %v756_v40 = vmul.f32 %v1058_v19, %v1533_v50 }
 0x20e   :  { %696 = vrot.lane.b32.xlu1 %v1524_v46, %s1160_s14 }
 0x212   :  { %v637_v47 = vpop.permute.xlu0 %636 }
 0x213   :  { %642 = vst.msk [vmem:[#allocation3 + $0x31] sm:$0xff] %vm590_vm14, %v637_v47  ;;  %v639_v48 = vpop.permute.xlu1 %638 }
 0x214   :  { %643 = vst.msk [vmem:[#allocation3 + $0x39] sm:$0xff] %vm590_vm14, %v639_v48 }
 0x215   :  { %651 = vst.msk [vmem:[#allocation3 + $0x39] sm:$0xff] %vm599_vm15, %v647_v49  ;;  %708 = vrot.lane.b32.xlu0 %v1524_v46, %s1159_s13 }
 0x216   :  { %762 = vrot.lane.b32.xlu1 %v1533_v50, %s1160_s14 }
 0x21a   :  { %v622_v51 = vpop.permute.xlu0 %621 }
 0x21b   :  { %626 = vst.msk [vmem:[#allocation3 + $0x21] sm:$0xff] %vm599_vm15, %v622_v51  ;;  %v645_v34 = vpop.permute.xlu1 %644  ;;  %v1059_v51 = vld [vmem:[#allocation8 + $0x2e] ss:$0 sm:$0xff] }
 0x21c   :  { %650 = vst.msk [vmem:[#allocation3 + $0x31] sm:$0xff] %vm599_vm15, %v645_v34  ;;  %v1571_v55 = vld [vmem:[#allocation3 + $0x3a] sm:$0x3f]  ;;  %v1073_v34 = vld [vmem:[#allocation8 + $0x2f] ss:$0 sm:$0xff] }
 0x21d   :  { %v1605_v60 = vld [vmem:[#allocation3 + $0x3c] sm:$0x3f] }
 0x222   :  { %v1539_v52 = vld [vmem:[#allocation3 + $0x20] sm:$0x3f] }
 0x223   :  { %764 = vrot.lane.b32.xlu2 %v1539_v52, %s1160_s14  ;;  %v1543_v37 = vld [vmem:[#allocation3 + $0x38] sm:$0x3f]  ;;  %v1545_v53 = vld [vmem:[#allocation3 + $0x30] sm:$0xff]  ;;  %v1559_v21 = vld [vmem:[#allocation3 + $0x22] sm:$0x3f] }
 0x224   :  { %864 = vrot.lane.b32.xlu1 %v1543_v37, %s1160_s14  ;;  %862 = vrot.lane.b32.xlu0 %v1545_v53, %s1160_s14  ;;  %v1561_v54 = vld [vmem:[#allocation3 + $0x1a] sm:$0xff]  ;;  %v1567_v15 = vld [vmem:[#allocation3 + $0x32] sm:$0xff]  ;;  %v1599_v24 = vld [vmem:[#allocation3 + $0x24] sm:$0x3f] }
 0x225   :  { %v1593_v58 = vld [vmem:[#allocation3 + $0x1c] sm:$0xff]  ;;  %v1597_v59 = vld [vmem:[#allocation3 + $0x34] sm:$0xff]  ;;  %v788_v46 = vmul.f32 %v1060_v41, %v1561_v54 }
 0x22b   :  { %774 = vrot.lane.b32.xlu2 %v1533_v50, %s1159_s13  ;;  %v1061_v50 = vld [vmem:[#allocation8 + $0x31] ss:$0 sm:$0xff] }
 0x22c   :  { %874 = vrot.lane.b32.xlu1 %v1545_v53, %s1159_s13  ;;  %776 = vrot.lane.b32.xlu0 %v1539_v52, %s1159_s13 }
 0x233   :  { %876 = vrot.lane.b32.xlu2 %v1543_v37, %s1159_s13 }
 0x234   :  { %798 = vrot.lane.b32.xlu1 %v1559_v21, %s1160_s14  ;;  %796 = vrot.lane.b32.xlu0 %v1561_v54, %s1160_s14 }
 0x23b   :  { %896 = vrot.lane.b32.xlu2 %v1567_v15, %s1160_s14 }
 0x23c   :  { %710 = vrot.lane.b32.xlu1 %v1518_v45, %s1159_s13  ;;  %898 = vrot.lane.b32.xlu0 %v1571_v55, %s1160_s14 }
 0x243   :  { %808 = vrot.lane.b32.xlu2 %v1561_v54, %s1159_s13 }
 0x244   :  { %908 = vrot.lane.b32.xlu1 %v1567_v15, %s1159_s13  ;;  %810 = vrot.lane.b32.xlu0 %v1559_v21, %s1159_s13 }
 0x24b   :  { %910 = vrot.lane.b32.xlu2 %v1571_v55, %s1159_s13 }
 0x24c   :  { %732 = vrot.lane.b32.xlu1 %v1585_v56, %s1160_s14  ;;  %730 = vrot.lane.b32.xlu0 %v1587_v57, %s1160_s14 }
 0x253   :  { %830 = vrot.lane.b32.xlu2 %v1593_v58, %s1160_s14 }
 0x254   :  { %930 = vrot.lane.b32.xlu1 %v1597_v59, %s1160_s14  ;;  %832 = vrot.lane.b32.xlu0 %v1599_v24, %s1160_s14 }
 0x25b   :  { %932 = vrot.lane.b32.xlu2 %v1605_v60, %s1160_s14 }
 0x25c   :  { %744 = vrot.lane.b32.xlu1 %v1585_v56, %s1159_s13  ;;  %742 = vrot.lane.b32.xlu0 %v1587_v57, %s1159_s13 }
 0x25f   :  { %v675_v18 = vpop.permute.xlu2 %674 }
 0x260   :  { %v680_v17 = vmul.f32 %v1065_v63, %v675_v18  ;;  %v1071_v18 = vld [vmem:[#allocation8 + $0x30] ss:$0 sm:$0xff] }
 0x263   :  { %842 = vrot.lane.b32.xlu2 %v1593_v58, %s1159_s13 }
 0x264   :  { %942 = vrot.lane.b32.xlu1 %v1597_v59, %s1159_s13  ;;  %844 = vrot.lane.b32.xlu0 %v1599_v24, %s1159_s13 }
 0x267   :  { %v699_v62 = vpop.permute.xlu2 %698 }
 0x268   :  { %v703_v32 = vmul.f32 %v1066_v12, %v699_v62 }
 0x26b   :  { %944 = vrot.lane.b32.xlu2 %v1605_v60, %s1159_s13 }
 0x277   :  { %v663_v0 = vpop.permute.xlu0 %662 }
 0x278   :  { %v665_v1 = vpop.permute.xlu1 %664  ;;  %v668_v2 = vmul.f32 %v1067_v22, %v663_v0 }
 0x279   :  { %v669_v4 = vmul.f32 %v1067_v22, %v665_v1  ;;  %v889_v1 = vmul.f32 %v1061_v50, %v1571_v55 }
 0x27a   :  { %v670_v6 = vadd.f32 %v668_v2, %v656_v16 }
 0x27b   :  { %v671_v7 = vadd.f32 %v669_v4, %v657_v3  ;;  %v757_v4 = vmul.f32 %v1058_v19, %v1539_v52  ;;  %v1074_v52 = vld [vmem:[#allocation8 + $0x2a] ss:$0 sm:$0xff] }
 0x27c   :  { %v682_v8 = vadd.f32 %v680_v17, %v670_v6  ;;  %v856_v17 = vmul.f32 %v1059_v51, %v1545_v53 }
 0x27d   :  { %v765_v9 = vpop.permute.xlu2 %764 }
 0x27e   :  { %v690_v11 = vadd.f32 %v688_v5, %v682_v8  ;;  %v769_v2 = vmul.f32 %v1068_v20, %v765_v9 }
 0x27f   :  { %v677_v13 = vpop.permute.xlu0 %676 }
 0x280   :  { %v697_v27 = vpop.permute.xlu1 %696  ;;  %v681_v28 = vmul.f32 %v1065_v63, %v677_v13  ;;  %v857_v63 = vmul.f32 %v1059_v51, %v1543_v37 }
 0x281   :  { %v702_v25 = vmul.f32 %v1066_v12, %v697_v27  ;;  %v789_v27 = vmul.f32 %v1060_v41, %v1559_v21 }
 0x282   :  { %v683_v30 = vadd.f32 %v681_v28, %v671_v7  ;;  %v888_v28 = vmul.f32 %v1061_v50, %v1567_v15  ;;  %v1072_v15 = vld [vmem:[#allocation8 + $0x32] ss:$0 sm:$0xff] }
 0x283   :  { %v704_v26 = vadd.f32 %v702_v25, %v690_v11  ;;  %v771_v11 = vadd.f32 %v769_v2, %v757_v4  ;;  %v1077_v4 = vld [vmem:[#allocation8 + $0x2c] ss:$0 sm:$0xff] }
 0x284   :  { %v691_v33 = vadd.f32 %v689_v29, %v683_v30  ;;  %v1076_v29 = vld [vmem:[#allocation8 + $0x29] ss:$0 sm:$0xff] }
 0x285   :  { %v775_v10 = vpop.permute.xlu2 %774 }
 0x286   :  { %v1627_v38 = vadd.f32 %v703_v32, %v691_v33  ;;  %v780_v44 = vmul.f32 %v1069_v39, %v775_v10  ;;  %v1063_v32 = vld [vmem:[#allocation8 + $0x2b] ss:$0 sm:$0xff] }
 0x287   :  { %v709_v14 = vpop.permute.xlu0 %708 }
 0x288   :  { %v763_v36 = vpop.permute.xlu1 %762  ;;  %v714_v31 = vmul.f32 %v1625_v35, %v709_v14  ;;  %v822_v14 = vmul.f32 %v1063_v32, %v1593_v58  ;;  %v823_v58 = vmul.f32 %v1063_v32, %v1599_v24 }
 0x289   :  { %v768_v42 = vmul.f32 %v1068_v20, %v763_v36 }
 0x28a   :  { %v1631_v43 = vadd.f32 %v714_v31, %v704_v26 }
 0x28b   :  { %v770_v45 = vadd.f32 %v768_v42, %v756_v40 }
 0x28d   :  { %v782_v47 = vadd.f32 %v780_v44, %v770_v45  ;;  %v877_v48 = vpop.permute.xlu2 %876  ;;  %v1075_v44 = vld [vmem:[#allocation8 + $0x33] ss:$0 sm:$0xff] }
 0x28e   :  { %v881_v16 = vmul.f32 %v1071_v18, %v877_v48 }
 0x28f   :  { %v790_v49 = vadd.f32 %v788_v46, %v782_v47  ;;  %v1064_v47 = vld [vmem:[#allocation8 + $0x34] ss:$0 sm:$0xff] }
 0x295   :  { %v897_v61 = vpop.permute.xlu2 %896 }
 0x296   :  { %v865_v22 = vpop.permute.xlu1 %864  ;;  %v863_v62 = vpop.permute.xlu0 %862  ;;  %v902_v42 = vmul.f32 %v1072_v15, %v897_v61 }
 0x297   :  { %v869_v0 = vmul.f32 %v1073_v34, %v865_v22  ;;  %v868_v54 = vmul.f32 %v1073_v34, %v863_v62 }
 0x299   :  { %v871_v23 = vadd.f32 %v869_v0, %v857_v63  ;;  %v870_v12 = vadd.f32 %v868_v54, %v856_v17  ;;  %v1062_v54 = vld [vmem:[#allocation8 + $0x22] ss:$0 sm:$0xff]  ;;  %v1080_v17 = vld [vmem:[#allocation8 + $0x23] ss:$0 sm:$0xff] }
 0x29b   :  { %v883_v3 = vadd.f32 %v881_v16, %v871_v23 }
 0x29d   :  { %v809_v6 = vpop.permute.xlu2 %808  ;;  %v891_v7 = vadd.f32 %v889_v1, %v883_v3 }
 0x29e   :  { %v875_v5 = vpop.permute.xlu1 %874  ;;  %v777_v8 = vpop.permute.xlu0 %776  ;;  %v814_v10 = vmul.f32 %v1074_v52, %v809_v6 }
 0x29f   :  { %v880_v37 = vmul.f32 %v1071_v18, %v875_v5  ;;  %v781_v13 = vmul.f32 %v1069_v39, %v777_v8  ;;  %v1079_v5 = vld [vmem:[#allocation8 + $0x2d] ss:$0 sm:$0xff] }
 0x2a1   :  { %v882_v55 = vadd.f32 %v880_v37, %v870_v12  ;;  %v783_v9 = vadd.f32 %v781_v13, %v771_v11  ;;  %v1083_v12 = vld [vmem:[#allocation8 + $0x24] ss:$0 sm:$0xff] }
 0x2a3   :  { %v890_v25 = vadd.f32 %v888_v28, %v882_v55  ;;  %v791_v30 = vadd.f32 %v789_v27, %v783_v9  ;;  %v1078_v27 = vld [vmem:[#allocation8 + $0x35] ss:$0 sm:$0xff]  ;;  %v923_v9 = vmul.f32 %v1064_v47, %v1605_v60 }
 0x2a5   :  { %v911_v33 = vpop.permute.xlu2 %910  ;;  %v904_v51 = vadd.f32 %v902_v42, %v890_v25  ;;  %v1081_v25 = vld [vmem:[#allocation8 + $0x36] ss:$0 sm:$0xff] }
 0x2a6   :  { %v799_v26 = vpop.permute.xlu1 %798  ;;  %v797_v53 = vpop.permute.xlu0 %796  ;;  %v915_v8 = vmul.f32 %v1075_v44, %v911_v33 }
 0x2a7   :  { %v802_v19 = vmul.f32 %v1076_v29, %v797_v53  ;;  %v803_v41 = vmul.f32 %v1076_v29, %v799_v26 }
 0x2a9   :  { %v804_v20 = vadd.f32 %v802_v19, %v790_v49  ;;  %v805_v48 = vadd.f32 %v803_v41, %v791_v30  ;;  %v922_v49 = vmul.f32 %v1064_v47, %v1597_v59  ;;  %v722_v59 = vmul.f32 %v1062_v54, %v1587_v57 }
 0x2ab   :  { %v816_v39 = vadd.f32 %v814_v10, %v804_v20  ;;  %v724_v55 = vadd.f32 %v722_v59, %v1631_v43  ;;  %v723_v10 = vmul.f32 %v1062_v54, %v1585_v56 }
 0x2ad   :  { %v824_v36 = vadd.f32 %v822_v14, %v816_v39  ;;  %v831_v40 = vpop.permute.xlu2 %830 }
 0x2ae   :  { %v711_v21 = vpop.permute.xlu1 %710  ;;  %v899_v31 = vpop.permute.xlu0 %898  ;;  %v836_v24 = vmul.f32 %v1077_v4, %v831_v40 }
 0x2af   :  { %v903_v61 = vmul.f32 %v1072_v15, %v899_v31  ;;  %v715_v37 = vmul.f32 %v1625_v35, %v711_v21 }
 0x2b1   :  { %v905_v6 = vadd.f32 %v903_v61, %v891_v7  ;;  %v838_v7 = vadd.f32 %v836_v24, %v824_v36  ;;  %v717_v57 = vadd.f32 %v715_v37, %v1627_v38 }
 0x2b3   :  { %v917_v13 = vadd.f32 %v915_v8, %v905_v6  ;;  %v725_v31 = vadd.f32 %v723_v10, %v717_v57 }
 0x2b5   :  { %v933_v63 = vpop.permute.xlu2 %932  ;;  %v925_v32 = vadd.f32 %v923_v9, %v917_v13 }
 0x2b6   :  { %v909_v45 = vpop.permute.xlu1 %908  ;;  %v811_v46 = vpop.permute.xlu0 %810  ;;  %v937_v33 = vmul.f32 %v1078_v27, %v933_v63 }
 0x2b7   :  { %v914_v34 = vmul.f32 %v1075_v44, %v909_v45  ;;  %v815_v18 = vmul.f32 %v1074_v52, %v811_v46  ;;  %v1082_v44 = vld [vmem:[#allocation8 + $0x37] ss:$0 sm:$0xff] }
 0x2b8   :  { %v939_v21 = vadd.f32 %v937_v33, %v925_v32 }
 0x2b9   :  { %v916_v22 = vadd.f32 %v914_v34, %v904_v51  ;;  %v817_v62 = vadd.f32 %v815_v18, %v805_v48 }
 0x2bb   :  { %v924_v50 = vadd.f32 %v922_v49, %v916_v22  ;;  %v825_v0 = vadd.f32 %v823_v58, %v817_v62 }
 0x2bd   :  { %v843_v1 = vpop.permute.xlu2 %842 }
 0x2be   :  { %v733_v16 = vpop.permute.xlu1 %732  ;;  %v731_v23 = vpop.permute.xlu0 %730  ;;  %v848_v28 = vmul.f32 %v1079_v5, %v843_v1 }
 0x2bf   :  { %v736_v11 = vmul.f32 %v1080_v17, %v731_v23  ;;  %v737_v20 = vmul.f32 %v1080_v17, %v733_v16 }
 0x2c0   :  { %v850_v19 = vadd.f32 %v848_v28, %v838_v7 }
 0x2c1   :  { %v738_v52 = vadd.f32 %v736_v11, %v724_v55  ;;  %v739_v36 = vadd.f32 %v737_v20, %v725_v31 }
 0x2c5   :  { %v945_v26 = vpop.permute.xlu2 %944 }
 0x2c6   :  { %v931_v2 = vpop.permute.xlu1 %930  ;;  %v833_v3 = vpop.permute.xlu0 %832  ;;  %v949_v14 = vmul.f32 %v1081_v25, %v945_v26 }
 0x2c7   :  { %v936_v43 = vmul.f32 %v1078_v27, %v931_v2  ;;  %v837_v39 = vmul.f32 %v1077_v4, %v833_v3 }
 0x2c8   :  { %v951_v40 = vadd.f32 %v949_v14, %v939_v21 }
 0x2c9   :  { %v938_v38 = vadd.f32 %v936_v43, %v924_v50  ;;  %v839_v45 = vadd.f32 %v837_v39, %v825_v0 }
 0x2ca   :  { %v957_v34 = vadd.f32 %v1082_v44, %v951_v40 }
 0x2ce   :  { %v745_v29 = vpop.permute.xlu1 %744  ;;  %v743_v30 = vpop.permute.xlu0 %742 }
 0x2cf   :  { %v748_v53 = vmul.f32 %v1083_v12, %v743_v30  ;;  %v749_v15 = vmul.f32 %v1083_v12, %v745_v29 }
 0x2d1   :  { %v750_v35 = vadd.f32 %v748_v53, %v738_v52  ;;  %v751_v48 = vadd.f32 %v749_v15, %v739_v36 }
 0x2d3   :  { %v952_v60 = vadd.f32 %v850_v19, %v750_v35 }
 0x2d6   :  { %v943_v41 = vpop.permute.xlu1 %942  ;;  %v845_v42 = vpop.permute.xlu0 %844 }
 0x2d7   :  { %v948_v46 = vmul.f32 %v1081_v25, %v943_v41  ;;  %v849_v47 = vmul.f32 %v1079_v5, %v845_v42 }
 0x2d9   :  { %v950_v51 = vadd.f32 %v948_v46, %v938_v38  ;;  %v851_v56 = vadd.f32 %v849_v47, %v839_v45 }
 0x2db   :  { %v956_v18 = vadd.f32 %v1082_v44, %v950_v51  ;;  %v953_v49 = vadd.f32 %v851_v56, %v751_v48 }
 0x2dd   :  { %v958_v58 = vadd.f32 %v956_v18, %v952_v60  ;;  %v959_v22 = vadd.f32 %v957_v34, %v953_v49 }
 0x2df   :  { %975 = vrot.lane.b32.xlu2 %v958_v58, %s1170_s24  ;;  %966 = vrot.lane.b32.xlu0 %v958_v58, %s1171_s25  ;;  %961 = vst.msk [vmem:[%s1676_s3] sm:$0xff] %vm960_vm0, %v958_v58 }
 0x2e0   :  { %968 = vrot.lane.b32.xlu1 %v959_v22, %s1171_s25  ;;  %963 = vst.msk [vmem:[%s1676_s3 + $0x8] sm:$0x3f] %vm962_vm1, %v959_v22 }
 0x2e7   :  { %977 = vrot.lane.b32.xlu0 %v959_v22, %s1170_s24 }
 0x339   :  { %v976_v62 = vpop.permute.xlu2 %975 }
 0x33a   :  { %1004 = vst.msk [vmem:[%s1676_s3 + $0x20] sm:$0xff] %vm960_vm0, %v976_v62 }
 0x351   :  { %v967_v63 = vpop.permute.xlu0 %966 }
 0x352   :  { %v969_v50 = vpop.permute.xlu1 %968  ;;  %1002 = vst.msk [vmem:[%s1676_s3 + $0x10] sm:$0xff] %vm960_vm0, %v967_v63 }
 0x353   :  { %1003 = vst.msk [vmem:[%s1676_s3 + $0x18] sm:$0x3f] %vm962_vm1, %v969_v50 }
 0x359   :  { %v978_v0 = vpop.permute.xlu0 %977 }
 0x35a   :  { %1005 = vst.msk [vmem:[%s1676_s3 + $0x28] sm:$0x3f] %vm962_vm1, %v978_v0 }
 0x35b   :  { %988 = vsyncpa [#allocation5], 1 }
 0x35c   :  { %989 = vsyncpa [#allocation9], 1 }
 0x35d   :  { %990 = vsyncpa [#allocation6], 1 }

</bundles_post_ra>
